<compile_context>
chip_gen: v7x
topology: tpu7x:2x2x1
jax: 0.10.0
libtpu: 0.0.40
codegen_flags: <defaults>
</compile_context>

<pallas_src>
import numpy as np
import jax
import jax.numpy as jnp
from jax.experimental import pallas as pl
from jax.experimental.pallas import tpu as pltpu


# ----------------------------------------------------------------------------
# Fused FFN kernel:  y = W2f @ SiLU(W1f @ x + b1) + b2
#   x_ref : (1, ed, tn)  bf16   (channels on sublanes, spatial tile on lanes)
#   w1_ref: (h, ed)      bf16   (BN1 scale folded in)
#   b1_ref: (h, 1)       f32
#   w2_ref: (ed, h)      bf16   (BN2 scale folded in)
#   b2_ref: (ed, 1)      f32
#   o_ref : (1, ed, tn)  f32
# ----------------------------------------------------------------------------
def _ffn_kernel(x_ref, w1_ref, b1_ref, w2_ref, b2_ref, o_ref):
    x = x_ref[0]                                                         # (ed, tn)
    y1 = jnp.dot(w1_ref[...], x, preferred_element_type=jnp.float32)    # pw1
    y1 = y1 + b1_ref[...]                                                # folded BN1
    a = y1 * jax.nn.sigmoid(y1)                                          # SiLU (f32)
    y2 = jnp.dot(w2_ref[...], a.astype(w2_ref.dtype),
                 preferred_element_type=jnp.float32)                     # pw2
    o_ref[0] = (y2 + b2_ref[...]).astype(o_ref.dtype)                    # folded BN2


def shsablock_ffn_forward(x_nchw, params, *, tn=None):
    """x_nchw: (B, ed, H, W) float32 NCHW. Returns (B, ed, H, W) float32."""
    B, ed, H, W = x_nchw.shape
    h = params["w1"].shape[0]
    N = H * W
    if tn is None:
        tn = N if N <= 512 else 512
    assert N % tn == 0, "spatial size must be divisible by the lane tile"

    # NCHW -> (B, ed, N): a pure reshape (no transpose); spatial goes on lanes.
    x_flat = x_nchw.reshape(B, ed, N).astype(jnp.bfloat16)

    out = pl.pallas_call(
        _ffn_kernel,
        out_shape=jax.ShapeDtypeStruct((B, ed, N), jnp.float32),
        grid=(B, N // tn),
        in_specs=[
            pl.BlockSpec((1, ed, tn), lambda b, n: (b, 0, n)),
            pl.BlockSpec((h, ed), lambda b, n: (0, 0)),
            pl.BlockSpec((h, 1), lambda b, n: (0, 0)),
            pl.BlockSpec((ed, h), lambda b, n: (0, 0)),
            pl.BlockSpec((ed, 1), lambda b, n: (0, 0)),
        ],
        out_specs=pl.BlockSpec((1, ed, tn), lambda b, n: (b, 0, n)),
        compiler_params=pltpu.CompilerParams(
            dimension_semantics=("parallel", "parallel")),
    )(x_flat, params["w1"], params["b1"], params["w2"], params["b2"])
    return out.reshape(B, ed, H, W)


# ----------------------------------------------------------------------------
# Parameter init (deterministic, synthetic), eval-mode BN folded into weights.
# Note: a freshly-initialized torch module has bn2.weight == 0 (bn_weight_init=0),
# which would make the output identically bn2.bias; here we use random BN stats
# to emulate a *trained* module so the full math path is exercised.
# ----------------------------------------------------------------------------
def init_params(key, ed, h):
    ks = iter(jax.random.split(key, 10))

    def w(shape, fan_in):
        return jax.random.normal(next(ks), shape, jnp.float32) / np.sqrt(fan_in)

    def bn_fold(c):
        gamma = 1.0 + 0.1 * jax.random.normal(next(ks), (c,), jnp.float32)
        beta = 0.1 * jax.random.normal(next(ks), (c,), jnp.float32)
        mean = 0.1 * jax.random.normal(next(ks), (c,), jnp.float32)
        var = jnp.abs(jax.random.normal(next(ks), (c,), jnp.float32)) + 0.5
        scale = gamma / jnp.sqrt(var + 1e-5)
        bias = beta - mean * scale
        return scale, bias

    w1 = w((h, ed), ed)           # pw1: Conv2d(ed, h, 1, bias=False) weight (h, ed)
    s1, b1 = bn_fold(h)
    w2 = w((ed, h), h)            # pw2: Conv2d(h, ed, 1, bias=False) weight (ed, h)
    s2, b2 = bn_fold(ed)

    return {
        "w1": (w1 * s1[:, None]).astype(jnp.bfloat16),   # BN1 scale folded
        "b1": b1.reshape(h, 1),
        "w2": (w2 * s2[:, None]).astype(jnp.bfloat16),   # BN2 scale folded
        "b2": b2.reshape(ed, 1),
    }


# ----------------------------------------------------------------------------
# Pure-JAX reference (same folded/bf16-operand math) for a correctness check.
# ----------------------------------------------------------------------------
def ref_forward(x_nchw, params):
    B, ed, H, W = x_nchw.shape
    x = x_nchw.reshape(B, ed, H * W).astype(jnp.bfloat16).astype(jnp.float32)
    w1 = params["w1"].astype(jnp.float32)
    w2 = params["w2"].astype(jnp.float32)
    y1 = jnp.einsum("he,ben->bhn", w1, x) + params["b1"]
    a = y1 * jax.nn.sigmoid(y1)
    y2 = jnp.einsum("eh,bhn->ben", w2, a) + params["b2"]
    return y2.reshape(B, ed, H, W)


# ----------------------------------------------------------------------------
if __name__ == "__main__":
    key = jax.random.PRNGKey(0)
    B, ed, h = 2, 128, 256          # ed = channels, h = hidden (FFN expansion)
    H, W = 16, 16

    k1, k2 = jax.random.split(key, 2)
    x = jax.random.normal(k1, (B, ed, H, W), jnp.float32)   # NCHW like the torch module
    params = init_params(k2, ed, h)

    out = shsablock_ffn_forward(x, params)
    out = jax.block_until_ready(out)

    assert out.shape == (B, ed, H, W), out.shape
    assert bool(jnp.all(jnp.isfinite(out)))

    ref = jax.block_until_ready(ref_forward(x, params))
    assert bool(jnp.allclose(out, ref, atol=1e-1, rtol=1e-1)), (
        float(jnp.max(jnp.abs(out - ref))))

    print("KERNEL_OK")
</pallas_src>

<mosaic_0001>
module attributes {stable_mosaic.version = 11 : i64} {
  func.func @_ffn_kernel(%arg0: i32, %arg1: i32, %arg2: memref<1x128x256xbf16, #tpu.memory_space<vmem>>, %arg3: memref<256x128xbf16, #tpu.memory_space<vmem>>, %arg4: memref<256x1xf32, #tpu.memory_space<vmem>>, %arg5: memref<128x256xbf16, #tpu.memory_space<vmem>>, %arg6: memref<128x1xf32, #tpu.memory_space<vmem>>, %arg7: memref<1x128x256xf32, #tpu.memory_space<vmem>>) attributes {dimension_semantics = [#tpu.dimension_semantics<parallel>, #tpu.dimension_semantics<parallel>], iteration_bounds = array<i64: 2, 1>, scalar_prefetch = 0 : i64, scratch_operands = 0 : i64, tpu.core_type = #tpu.core_type<tc>, window_params = [{transform_indices = @transform_0, window_bounds = array<i64: 1, 128, 256>}, {pipeline_mode = #tpu.pipeline_mode<synchronous>, transform_indices = @transform_1, window_bounds = array<i64: 256, 128>}, {pipeline_mode = #tpu.pipeline_mode<synchronous>, transform_indices = @transform_2, window_bounds = array<i64: 256, 1>}, {pipeline_mode = #tpu.pipeline_mode<synchronous>, transform_indices = @transform_3, window_bounds = array<i64: 128, 256>}, {pipeline_mode = #tpu.pipeline_mode<synchronous>, transform_indices = @transform_4, window_bounds = array<i64: 128, 1>}, {transform_indices = @transform_5, window_bounds = array<i64: 1, 128, 256>}]} {
    %c0 = arith.constant 0 : index
    %c0_0 = arith.constant 0 : index
    %c0_1 = arith.constant 0 : index
    %0 = vector.load %arg2[%c0, %c0_0, %c0_1] : memref<1x128x256xbf16, #tpu.memory_space<vmem>>, vector<1x128x256xbf16>
    %1 = vector.shape_cast %0 : vector<1x128x256xbf16> to vector<128x256xbf16>
    %c0_2 = arith.constant 0 : index
    %c0_3 = arith.constant 0 : index
    %2 = vector.load %arg3[%c0_2, %c0_3] : memref<256x128xbf16, #tpu.memory_space<vmem>>, vector<256x128xbf16>
    %cst = arith.constant dense<0.000000e+00> : vector<256x256xf32>
    %3 = tpu.matmul %2, %1, %cst {dimension_numbers = #tpu.dot_dimension_numbers<[1], [0], [0], [1], [0, 0, 1, 1], [], []>} : vector<256x128xbf16>, vector<128x256xbf16>, vector<256x256xf32> -> vector<256x256xf32>
    %c0_4 = arith.constant 0 : index
    %c0_5 = arith.constant 0 : index
    %4 = vector.load %arg4[%c0_4, %c0_5] : memref<256x1xf32, #tpu.memory_space<vmem>>, vector<256x1xf32>
    %5 = vector.broadcast %4 : vector<256x1xf32> to vector<256x256xf32>
    %6 = arith.addf %3, %5 : vector<256x256xf32>
    %7 = arith.negf %6 : vector<256x256xf32>
    %8 = math.exp %7 : vector<256x256xf32>
    %cst_6 = arith.constant 1.000000e+00 : f32
    %9 = vector.broadcast %cst_6 : f32 to vector<256x256xf32>
    %10 = arith.addf %9, %8 : vector<256x256xf32>
    %11 = arith.divf %9, %10 : vector<256x256xf32>
    %12 = arith.mulf %6, %11 : vector<256x256xf32>
    %c0_7 = arith.constant 0 : index
    %c0_8 = arith.constant 0 : index
    %13 = vector.load %arg5[%c0_7, %c0_8] : memref<128x256xbf16, #tpu.memory_space<vmem>>, vector<128x256xbf16>
    %14 = arith.truncf %12 : vector<256x256xf32> to vector<256x256xbf16>
    %cst_9 = arith.constant dense<0.000000e+00> : vector<128x256xf32>
    %15 = tpu.matmul %13, %14, %cst_9 {dimension_numbers = #tpu.dot_dimension_numbers<[1], [0], [0], [1], [0, 0, 1, 1], [], []>} : vector<128x256xbf16>, vector<256x256xbf16>, vector<128x256xf32> -> vector<128x256xf32>
    %c0_10 = arith.constant 0 : index
    %c0_11 = arith.constant 0 : index
    %16 = vector.load %arg6[%c0_10, %c0_11] : memref<128x1xf32, #tpu.memory_space<vmem>>, vector<128x1xf32>
    %17 = vector.broadcast %16 : vector<128x1xf32> to vector<128x256xf32>
    %18 = arith.addf %15, %17 : vector<128x256xf32>
    %c0_12 = arith.constant 0 : index
    %c0_13 = arith.constant 0 : index
    %c0_14 = arith.constant 0 : index
    %19 = vector.load %arg7[%c0_12, %c0_13, %c0_14] : memref<1x128x256xf32, #tpu.memory_space<vmem>>, vector<1x128x256xf32>
    %20 = vector.shape_cast %19 : vector<1x128x256xf32> to vector<128x256xf32>
    %21 = vector.shape_cast %18 : vector<128x256xf32> to vector<1x128x256xf32>
    tpu.vector_store %arg7[%c0_12, %c0_13, %c0_14], %21 {strides = array<i32>} : memref<1x128x256xf32, #tpu.memory_space<vmem>>, vector<1x128x256xf32>,
    return
  }
  func.func @transform_0(%arg0: i32, %arg1: i32) -> (i32, i32, i32) {
    %c0_i32 = arith.constant 0 : i32
    %c0_i32_0 = arith.constant 0 : i32
    return %arg0, %c0_i32, %arg1 : i32, i32, i32
  }
  func.func @transform_1(%arg0: i32, %arg1: i32) -> (i32, i32) {
    %c0_i32 = arith.constant 0 : i32
    %c0_i32_0 = arith.constant 0 : i32
    %c0_i32_1 = arith.constant 0 : i32
    return %c0_i32, %c0_i32_0 : i32, i32
  }
  func.func @transform_2(%arg0: i32, %arg1: i32) -> (i32, i32) {
    %c0_i32 = arith.constant 0 : i32
    %c0_i32_0 = arith.constant 0 : i32
    %c0_i32_1 = arith.constant 0 : i32
    return %c0_i32, %c0_i32_0 : i32, i32
  }
  func.func @transform_3(%arg0: i32, %arg1: i32) -> (i32, i32) {
    %c0_i32 = arith.constant 0 : i32
    %c0_i32_0 = arith.constant 0 : i32
    %c0_i32_1 = arith.constant 0 : i32
    return %c0_i32, %c0_i32_0 : i32, i32
  }
  func.func @transform_4(%arg0: i32, %arg1: i32) -> (i32, i32) {
    %c0_i32 = arith.constant 0 : i32
    %c0_i32_0 = arith.constant 0 : i32
    %c0_i32_1 = arith.constant 0 : i32
    return %c0_i32, %c0_i32_0 : i32, i32
  }
  func.func @transform_5(%arg0: i32, %arg1: i32) -> (i32, i32, i32) {
    %c0_i32 = arith.constant 0 : i32
    %c0_i32_0 = arith.constant 0 : i32
    return %arg0, %c0_i32, %arg1 : i32, i32, i32
  }
}

</mosaic_0001>

<bundles_post_ra>
// kernel: tpu_custom_call.1
= control target key start
LH: loop header
LB: loop body
LE: loop exit
PB: predicated region body
PF: predicated region fallthrough
CT: control target
= control target key end

     0   :  { %10 = vsyncpa [#allocation3], 0  ;;  %s3150_s0 = inlined_call_operand.vmem [shape: bf16[2,128,256], index: 0, kind: input, shape index: {}]   ;;  %s3151_s1 = inlined_call_operand.vmem [shape: bf16[256,128], index: 1, kind: input, shape index: {}]   ;;  %s3152_s2 = inlined_call_operand.vmem [shape: f32[256,1], index: 2, kind: input, shape index: {}]   ;;  %s3153_s3 = inlined_call_operand.hbm [shape: bf16[128,256], index: 3, kind: input, shape index: {}]   ;;  %s3154_s4 = inlined_call_operand.vmem [shape: f32[128,1], index: 4, kind: input, shape index: {}]   ;;  %s3155_s5 = inlined_call_operand.hbm [shape: f32[2,128,256], index: 5, kind: output, shape index: {}]  }
   0x1   :  { %11 = vsyncpa [#allocation4], 0 }
   0x2   :  { %13 = vsyncpa [#allocation4 + $0x1], 0  ;;  %s2474_s18 = smov 0   ;;  %s2476_s19 = smov 0  }
   0x3   :  { %s2478_s20 = smov 0   ;;  %s2480_s21 = smov 0  }
   0x4   :  { %s2482_s22 = smov 0   ;;  %s2484_s23 = smov 0  }
   0x5 LB: > { %s1803_s24 = sadd.s32 4294967295, %s2435_s23   ;;  %s1804_s25 = sadd.s32 4294967294, %s2435_s23   ;;  %s2435_s23 = sphi %s2484_s23, %s19_s23   ;;  %s2431_s22 = sphi %s2482_s22, %s3173_s22   ;;  %s2427_s21 = sphi %s2480_s21, %s3172_s21   ;;  %s2423_s20 = sphi %s2478_s20, %s3171_s20   ;;  %s2419_s19 = sphi %s2476_s19, %s3170_s19   ;;  %s2415_s18 = sphi %s2474_s18, %s3169_s18  }
   0x6   : > { %s31_s26 = sadd.s32 1, %s2431_s22  ;;  %s152_s27 = sadd.s32 1, %s2423_s20 }
   0x7   : > { %p33_p0 = scmp.ge.s32.totalorder %s31_s26, 2  ;;  %p162_p1 = scmp.ne.s32.totalorder %s2423_s20, %s2419_s19 }
   0x8   : > { %p163_p2 = scmp.eq.s32.totalorder %s1803_s24, 1  ;;  %p168_p3 = scmp.ne.s32.totalorder %s2419_s19, %s2415_s18 }
   0x9   : > { %s3175_s26 = smov (%p33_p0, %s31_s26), 0  ;;  %p169_p5 = scmp.eq.s32.totalorder %s1804_s25, 1 }
   0xa   : > { %p2514_p4 = por %p163_p2, %p162_p1  ;;  %s147_s29 = ssub.s32 %s2431_s22, %s3175_s26 }
   0xb   : > { %p1805_p6 = scmp.ge.s32.totalorder %s2435_s23, 1  ;;  %p150_p7 = scmp.eq.s32.totalorder %s147_s29, 0 }
   0xc   : > { %s3160_s28 = scalar_select %p2514_p4, 1, 0 }
   0xd   : > { %p2521_p8 = por %p169_p5, %p168_p3  ;;  %p176_p9 = scmp.lt.s32.totalorder %s2435_s23, 3 }
   0xe   : > { %s2527_s6 = scalar_select %p150_p7, %s2423_s20, %s152_s27  }
   0xf   : > { %s3161_s30 = scalar_select %p2521_p8, 1, 0 }
  0x10   : > { %p2529_p10 = pnand %p1805_p6, %p176_p9  ;;  %p2533_p11 = scmp.eq.s32.totalorder %s1803_s24, 0 }
  0x11   : > { %s2437_s9 = smov [#allocation2]   ;;  %s2325_s14 = scalar_lea.hbm %s3153_s3, 2048 }
  0x12   : > { %s3162_s7 = scalar_select %p2529_p10, 1, 0 }
  0x13   : > { %s3163_s8 = scalar_select %p2533_p11, 1, 0 }
  0x14   : > { %p1938_p12 = pneg %p2529_p10  ;;  %s194_s10 = sshll.u32 %s2437_s9, 4  ;;  %s195_s10 = int_to_ptr.vmem [resolvable:$true] %s194_s10 }
  0x15   : > { %p2326_p0 = scmp.ne.s32.totalorder %s3153_s3, %s2325_s14  ;;  %p2332_p5 = scmp.lt.u32.totalorder %s2325_s14, %s3153_s3 }
  0x16   : > { %p2541_p13 = pnand %p2533_p11, %p1938_p12 }
  0x18   : > { %p2327_p1 = pneg %p2541_p13 }
  0x1a   : > { %p2328_p2 = pnand %p2327_p1, %p2326_p0 }
  0x1c   : > { %p2329_p3 = pneg %p2328_p2 }
  0x1e   : > { %p2334_p6 = pnand %p2332_p5, %p2329_p3 }
  0x20   : > { %2337 = shalt.err (!%p2334_p6)
}
  0x21   : > { %s2338_s25 = scalar_lea.vmem %s195_s10, 2048  ;;  %p2346_p8 = scmp.lt.s32.totalorder %s195_s10, %s195_s10 }
  0x22   : > { %p2339_p7 = scmp.ne.s32.totalorder %s195_s10, %s2338_s25  ;;  %p2347_p4 = scmp.lt.s32.totalorder %s2338_s25, %s2338_s25 }
  0x24   : > { %p2341_p9 = pnand %p2339_p7, %p2327_p1  ;;  %p2348_p11 = por %p2347_p4, %p2346_p8 }
  0x26   : > { %p2342_p12 = pneg %p2341_p9 }
  0x28   : > { %p2349_p10 = pnand %p2348_p11, %p2342_p12 }
  0x2a   : > { %2352 = shalt.err (!%p2349_p10)
}
  0x2b   : > { %s2438_s27 = smov 128   ;;  %s2439_s29 = smov 8  }
  0x2c   : > { %1941 = dma.hbm_to_vmem [thread:$0]  (!%p2541_p13), %s3153_s3, 2048, %s195_s10, [#allocation3], %s2438_s27, %s2438_s27, %s2439_s29  }
  0x2d   : > { %p3165_p0 = scmp.ne.s32.totalorder %s3162_s7, 0 }
  0x2e   : > { %p3166_p2 = scmp.ne.s32.totalorder (!%p3165_p0), %s3163_s8, 0 }
  0x2f   : > { %226 = sbr.rel (%p3165_p0) target bundleno = 757 (0x2f5), region = 40 }
  0x36   : > { %2406 = dma.done.wait (%p3166_p2), [#allocation3], 2048  }
  0x37   : > { %2408 = vsyncadd (%p3166_p2), [#allocation3], 4294965248  ;;  %p259_p4 = scmp.lt.s32.totalorder %s2427_s21, 1  ;;  %v2440_v0 = vmov 0   ;;  %v318_v12 = vld [vmem:[%s3152_s2] sm:$0xff]  ;;  %v320_v13 = vld [vmem:[%s3152_s2 + $0x10] sm:$0xff] }
  0x38   : > { %718 = vmatprep.mubr.bf16.mxu0 %v2440_v0  ;;  %2003 = vset.pattern.permute.xlu0 %v2440_v0  ;;  %v319_v15 = vld [vmem:[%s3152_s2 + $0x8] sm:$0xff]  ;;  %v321_v17 = vld [vmem:[%s3152_s2 + $0x18] sm:$0xff]  ;;  %v322_v19 = vld [vmem:[%s3152_s2 + $0x20] sm:$0xff]  ;;  %s255_s9 = sand.u32 1, %s2419_s19   ;;  %p3167_p10 = scmp.ne.s32.totalorder %s3160_s28, 0 }
  0x39   : > { %s260_s11 = scalar_select %p259_p4, %s2427_s21, 1  ;;  %2004 = vset.pattern.permute.xlu1 %v2440_v0  ;;  %352 = vperm.xlu0 %2003, %v318_v12   ;;  %v323_v21 = vld [vmem:[%s3152_s2 + $0x28] sm:$0xff]  ;;  %v324_v23 = vld [vmem:[%s3152_s2 + $0x30] sm:$0xff]  ;;  %v325_v24 = vld [vmem:[%s3152_s2 + $0x38] sm:$0xff] }
  0x3a   : > { %362 = vperm.xlu1 %2004, %v320_v13   ;;  %v2029_v25 = vld [vmem:[%s3151_s1] sm:$0xff]   ;;  %v327_v27 = vld [vmem:[%s3152_s2 + $0x48] sm:$0xff]  ;;  %v328_v28 = vld [vmem:[%s3152_s2 + $0x50] sm:$0xff]  ;;  %s1810_s12 = sshll.u32 %s255_s9, 8  ;;  %s2441_s17 = smov [#allocation5]  }
  0x3b   : > { %s1930_s10 = sshll.u32 %s260_s11, 7  ;;  %v326_v26 = vld [vmem:[%s3152_s2 + $0x40] sm:$0xff]  ;;  %v329_v29 = vld [vmem:[%s3152_s2 + $0x58] sm:$0xff]  ;;  %v2030_v30 = vld [vmem:[%s3151_s1 + $0x8] sm:$0xff]   ;;  %s3059_s11 = scalar_lea.vmem [#allocation5], %s1810_s12 }
  0x3c   : > { %s2575_s14 = scalar_lea.vmem %s3150_s0, %s1930_s10  ;;  %v330_v31 = vld [vmem:[%s3152_s2 + $0x60] sm:$0xff]  ;;  %v331_v32 = vld [vmem:[%s3152_s2 + $0x68] sm:$0xff]  ;;  %v332_v33 = vld [vmem:[%s3152_s2 + $0x70] sm:$0xff]  ;;  %s1931_s10 = sshll.u32 %s2427_s21, 12 }
  0x3d   : > { %v2005_v1 = vld [vmem:[%s2575_s14 + $0x4] ss:$8 sps:$4 sm:$0xff]   ;;  %v2007_v2 = vld [vmem:[%s2575_s14] ss:$8 sps:$4 sm:$0xff]   ;;  %v2008_v3 = vld [vmem:[%s2575_s14 + $0x14] ss:$8 sps:$4 sm:$0xff]   ;;  %357 = vperm.xlu0 %2003, %v319_v15   ;;  %s3095_s15 = scalar_lea.hbm %s3155_s5, %s1931_s10 }
  0x3e   : > { %686 = vmatprep.subr.bf16.mxu0 %v2005_v1  ;;  %v2010_v4 = vld [vmem:[%s2575_s14 + $0x10] ss:$8 sps:$4 sm:$0xff]   ;;  %v2011_v5 = vld [vmem:[%s2575_s14 + $0x24] ss:$8 sps:$4 sm:$0xff]   ;;  %v2013_v6 = vld [vmem:[%s2575_s14 + $0x20] ss:$8 sps:$4 sm:$0xff]   ;;  %367 = vperm.xlu1 %2004, %v321_v17  }
  0x3f   : > { %687 = vmatpush1.bf16.msra.mxu0 %v2007_v2  ;;  %v2014_v7 = vld [vmem:[%s2575_s14 + $0x34] ss:$8 sps:$4 sm:$0xff]   ;;  %v2016_v8 = vld [vmem:[%s2575_s14 + $0x30] ss:$8 sps:$4 sm:$0xff]   ;;  %v2017_v9 = vld [vmem:[%s2575_s14 + $0x44] ss:$8 sps:$4 sm:$0xff]  }
  0x40   : > { %688 = vmatprep.subr.bf16.mxu0 %v2008_v3  ;;  %v2019_v10 = vld [vmem:[%s2575_s14 + $0x40] ss:$8 sps:$4 sm:$0xff]   ;;  %v2020_v11 = vld [vmem:[%s2575_s14 + $0x54] ss:$8 sps:$4 sm:$0xff]   ;;  %v2022_v14 = vld [vmem:[%s2575_s14 + $0x50] ss:$8 sps:$4 sm:$0xff]  }
  0x41   : > { %v2023_v16 = vld [vmem:[%s2575_s14 + $0x64] ss:$8 sps:$4 sm:$0xff]   ;;  %v2025_v18 = vld [vmem:[%s2575_s14 + $0x60] ss:$8 sps:$4 sm:$0xff]   ;;  %v2026_v20 = vld [vmem:[%s2575_s14 + $0x74] ss:$8 sps:$4 sm:$0xff]   ;;  %372 = vperm.xlu0 %2003, %v322_v19  }
  0x42   : > { %v2028_v22 = vld [vmem:[%s2575_s14 + $0x70] ss:$8 sps:$4 sm:$0xff]   ;;  %377 = vperm.xlu1 %2004, %v323_v21   ;;  %v334_v36 = vld [vmem:[%s3152_s2 + $0x80] sm:$0xff]  ;;  %v335_v37 = vld [vmem:[%s3152_s2 + $0x88] sm:$0xff]  ;;  %s1712_s7 = sshll.u32 %s3059_s11, 4  ;;  %s3104_s21 = scalar_lea.sflag [#allocation4], %s255_s9  ;;  %s3097_s7 = int_to_ptr.vmem [resolvable:$true] %s1712_s7 }
  0x43   : > { %689 = vmatpush1.bf16.msra.mxu0 %v2010_v4  ;;  %v333_v34 = vld [vmem:[%s3152_s2 + $0x78] sm:$0xff]  ;;  %v2031_v35 = vld [vmem:[%s3151_s1 + $0x10] sm:$0xff]   ;;  %v338_v41 = vld [vmem:[%s3152_s2 + $0xa0] sm:$0xff]  ;;  %s2353_s16 = scalar_lea.vmem %s3097_s7, 4096  ;;  %s2357_s24 = sshll.u32 %s2441_s17, 4  ;;  %s2358_s24 = int_to_ptr.vmem [resolvable:$false] %s2357_s24 }
  0x44   : > { %690 = vmatprep.subr.bf16.mxu0 %v2011_v5  ;;  %v336_v38 = vld [vmem:[%s3152_s2 + $0x90] sm:$0xff]  ;;  %v337_v39 = vld [vmem:[%s3152_s2 + $0x98] sm:$0xff]  ;;  %v339_v42 = vld [vmem:[%s3152_s2 + $0xa8] sm:$0xff]  ;;  %p2354_p8 = scmp.ne.s32.totalorder %s3097_s7, %s2353_s16  ;;  %s2359_s25 = scalar_lea.vmem %s2358_s24, 8192 }
  0x45   : > { %382 = vperm.xlu0 %2003, %v324_v23   ;;  %v2032_v40 = vld [vmem:[%s3151_s1 + $0x18] sm:$0xff]   ;;  %v340_v43 = vld [vmem:[%s3152_s2 + $0xb0] sm:$0xff]  ;;  %v2033_v45 = vld [vmem:[%s3151_s1 + $0x20] sm:$0xff]   ;;  %p2360_p1 = scmp.lt.s32.totalorder %s3097_s7, %s2358_s24  ;;  %p2361_p3 = scmp.lt.s32.totalorder %s2359_s25, %s2353_s16 }
  0x46   : > { %387 = vperm.xlu1 %2004, %v325_v24   ;;  %v341_v44 = vld [vmem:[%s3152_s2 + $0xb8] sm:$0xff]  ;;  %v342_v46 = vld [vmem:[%s3152_s2 + $0xc0] sm:$0xff]  ;;  %v343_v47 = vld [vmem:[%s3152_s2 + $0xc8] sm:$0xff]  ;;  %p2355_p11 = pnand %p2354_p8, %p3167_p10 }
  0x47   : > { %691 = vmatpush1.bf16.msra.mxu0 %v2013_v6  ;;  %v344_v48 = vld [vmem:[%s3152_s2 + $0xd0] sm:$0xff]  ;;  %v345_v49 = vld [vmem:[%s3152_s2 + $0xd8] sm:$0xff]  ;;  %v2034_v50 = vld [vmem:[%s3151_s1 + $0x28] sm:$0xff]   ;;  %p2362_p5 = por %p2361_p3, %p2360_p1 }
  0x48   : > { %692 = vmatprep.subr.bf16.mxu0 %v2014_v7  ;;  %v346_v51 = vld [vmem:[%s3152_s2 + $0xe0] sm:$0xff]  ;;  %v347_v52 = vld [vmem:[%s3152_s2 + $0xe8] sm:$0xff]  ;;  %v348_v53 = vld [vmem:[%s3152_s2 + $0xf0] sm:$0xff]  ;;  %p2356_p13 = pneg %p2355_p11 }
  0x49   : > { %392 = vperm.xlu0 %2003, %v326_v26   ;;  %v349_v54 = vld [vmem:[%s3152_s2 + $0xf8] sm:$0xff]  ;;  %v2035_v55 = vld [vmem:[%s3151_s1 + $0x30] sm:$0xff]   ;;  %v1375_v56 = vld [vmem:[%s3154_s4] sm:$0xff] }
  0x4a   : > { %397 = vperm.xlu1 %2004, %v327_v27   ;;  %v1376_v57 = vld [vmem:[%s3154_s4 + $0x8] sm:$0xff]  ;;  %v1377_v58 = vld [vmem:[%s3154_s4 + $0x10] sm:$0xff]  ;;  %v1378_v59 = vld [vmem:[%s3154_s4 + $0x18] sm:$0xff]  ;;  %p2363_p6 = pnand %p2362_p5, %p2356_p13 }
  0x4b   : > { %693 = vmatpush1.bf16.msra.mxu0 %v2016_v8  ;;  %v2036_v60 = vld [vmem:[%s3151_s1 + $0x38] sm:$0xff]   ;;  %v1379_v61 = vld [vmem:[%s3154_s4 + $0x20] sm:$0xff]  ;;  %v1380_v62 = vld [vmem:[%s3154_s4 + $0x28] sm:$0xff] }
  0x4c   : > { %694 = vmatprep.subr.bf16.mxu0 %v2017_v9  ;;  %v1381_v63 = vld [vmem:[%s3154_s4 + $0x30] sm:$0xff]  ;;  %v1382_v1 = vld [vmem:[%s3154_s4 + $0x38] sm:$0xff]  ;;  %v2037_v2 = vld [vmem:[%s3151_s1 + $0x40] sm:$0xff]  }
  0x4d   : > { %402 = vperm.xlu0 %2003, %v328_v28   ;;  %v1383_v3 = vld [vmem:[%s3154_s4 + $0x40] sm:$0xff]  ;;  %v1384_v4 = vld [vmem:[%s3154_s4 + $0x48] sm:$0xff]  ;;  %v1385_v5 = vld [vmem:[%s3154_s4 + $0x50] sm:$0xff] }
  0x4e   : > { %407 = vperm.xlu1 %2004, %v329_v29   ;;  %v1386_v6 = vld [vmem:[%s3154_s4 + $0x58] sm:$0xff]  ;;  %v2038_v7 = vld [vmem:[%s3151_s1 + $0x48] sm:$0xff]   ;;  %v1387_v8 = vld [vmem:[%s3154_s4 + $0x60] sm:$0xff] }
  0x4f   : > { %695 = vmatpush1.bf16.msra.mxu0 %v2019_v10  ;;  %v1388_v9 = vld [vmem:[%s3154_s4 + $0x68] sm:$0xff]  ;;  %v1389_v10 = vld [vmem:[%s3154_s4 + $0x70] sm:$0xff]  ;;  %v2040_v13 = vld [vmem:[%s3151_s1 + $0x58] sm:$0xff]  }
  0x50   : > { %696 = vmatprep.subr.bf16.mxu0 %v2020_v11  ;;  %v1390_v11 = vld [vmem:[%s3154_s4 + $0x78] sm:$0xff]  ;;  %v2039_v12 = vld [vmem:[%s3151_s1 + $0x50] sm:$0xff]   ;;  %v2042_v15 = vld [vmem:[%s3151_s1 + $0x68] sm:$0xff]  }
  0x51   : > { %412 = vperm.xlu0 %2003, %v330_v31   ;;  %v2044_v17 = vld [vmem:[%s3151_s1 + $0x78] sm:$0xff]  }
  0x52   : > { %417 = vperm.xlu1 %2004, %v331_v32  }
  0x53   : > { %697 = vmatpush1.bf16.msra.mxu0 %v2022_v14  ;;  %v2041_v14 = vld [vmem:[%s3151_s1 + $0x60] sm:$0xff]  }
  0x54   : > { %698 = vmatprep.subr.bf16.mxu0 %v2023_v16  ;;  %v2043_v16 = vld [vmem:[%s3151_s1 + $0x70] sm:$0xff]  }
  0x55   : > { %422 = vperm.xlu0 %2003, %v332_v33  }
  0x56   : > { %427 = vperm.xlu1 %2004, %v333_v34  }
  0x57   : > { %699 = vmatpush1.bf16.msra.mxu0 %v2025_v18 }
  0x58   : > { %700 = vmatprep.subr.bf16.mxu0 %v2026_v20 }
  0x59   : > { %432 = vperm.xlu0 %2003, %v334_v36  }
  0x5a   : > { %437 = vperm.xlu1 %2004, %v335_v37  }
  0x5b   : > { %701 = vmatpush1.bf16.msra.mxu0 %v2028_v22 }
  0x5d   : > { %442 = vperm.xlu0 %2003, %v336_v38  }
  0x5e   : > { %719 = vmatmul.mubr.bf16.vlgmr.msra.gmra.mrb[0].mxu0 %v2029_v25  ;;  %447 = vperm.xlu1 %2004, %v337_v39  }
  0x5f   : > { %728 = vmatprep.mubr.bf16.mxu0 %v2440_v0 }
  0x61   : > { %452 = vperm.xlu0 %2003, %v338_v41  }
  0x62   : > { %457 = vperm.xlu1 %2004, %v339_v42  }
  0x65   : > { %462 = vperm.xlu0 %2003, %v340_v43  }
  0x66   : > { %729 = vmatmul.mubr.bf16.gmra.mrb[4].mxu0 %v2030_v30  ;;  %467 = vperm.xlu1 %2004, %v341_v44  }
  0x67   : > { %738 = vmatprep.mubr.bf16.mxu0 %v2440_v0 }
  0x69   : > { %472 = vperm.xlu0 %2003, %v342_v46  }
  0x6a   : > { %477 = vperm.xlu1 %2004, %v343_v47  }
  0x6d   : > { %482 = vperm.xlu0 %2003, %v344_v48  }
  0x6e   : > { %739 = vmatmul.mubr.bf16.gmra.mrb[8].mxu0 %v2031_v35  ;;  %487 = vperm.xlu1 %2004, %v345_v49  }
  0x6f   : > { %748 = vmatprep.mubr.bf16.mxu0 %v2440_v0 }
  0x71   : > { %492 = vperm.xlu0 %2003, %v346_v51  }
  0x72   : > { %497 = vperm.xlu1 %2004, %v347_v52  }
  0x75   : > { %502 = vperm.xlu0 %2003, %v348_v53  }
  0x76   : > { %749 = vmatmul.mubr.bf16.gmra.mrb[12].mxu0 %v2032_v40  ;;  %507 = vperm.xlu1 %2004, %v349_v54  }
  0x77   : > { %758 = vmatprep.mubr.bf16.mxu0 %v2440_v0 }
  0x79   : > { %1393 = vperm.xlu0 %2003, %v1375_v56  }
  0x7a   : > { %1398 = vperm.xlu1 %2004, %v1376_v57  }
  0x7d   : > { %1403 = vperm.xlu0 %2003, %v1377_v58  }
  0x7e   : > { %759 = vmatmul.mubr.bf16.gmra.mrb[16].mxu0 %v2033_v45  ;;  %1408 = vperm.xlu1 %2004, %v1378_v59  }
  0x7f   : > { %768 = vmatprep.mubr.bf16.mxu0 %v2440_v0 }
  0x81   : > { %1413 = vperm.xlu0 %2003, %v1379_v61  }
  0x82   : > { %1418 = vperm.xlu1 %2004, %v1380_v62  }
  0x85   : > { %1423 = vperm.xlu0 %2003, %v1381_v63  }
  0x86   : > { %769 = vmatmul.mubr.bf16.gmra.mrb[20].mxu0 %v2034_v50  ;;  %1428 = vperm.xlu1 %2004, %v1382_v1  }
  0x87   : > { %778 = vmatprep.mubr.bf16.mxu0 %v2440_v0 }
  0x89   : > { %1433 = vperm.xlu0 %2003, %v1383_v3  }
  0x8a   : > { %1438 = vperm.xlu1 %2004, %v1384_v4  }
  0x8d   : > { %1443 = vperm.xlu0 %2003, %v1385_v5  }
  0x8e   : > { %779 = vmatmul.mubr.bf16.gmra.mrb[24].mxu0 %v2035_v55  ;;  %1448 = vperm.xlu1 %2004, %v1386_v6  }
  0x8f   : > { %788 = vmatprep.mubr.bf16.mxu0 %v2440_v0 }
  0x91   : > { %1453 = vperm.xlu0 %2003, %v1387_v8  }
  0x92   : > { %1458 = vperm.xlu1 %2004, %v1388_v9  }
  0x95   : > { %1463 = vperm.xlu0 %2003, %v1389_v10  }
  0x96   : > { %789 = vmatmul.mubr.bf16.gmra.mrb[28].mxu0 %v2036_v60  ;;  %1468 = vperm.xlu1 %2004, %v1390_v11  }
  0x97   : > { %798 = vmatprep.mubr.bf16.mxu0 %v2440_v0 }
  0x9e   : > { %799 = vmatmul.mubr.bf16.gmra.mrb[32].mxu0 %v2037_v2 }
  0x9f   : > { %808 = vmatprep.mubr.bf16.mxu0 %v2440_v0 }
  0xa6   : > { %809 = vmatmul.mubr.bf16.gmra.mrb[36].mxu0 %v2038_v7 }
  0xa7   : > { %818 = vmatprep.mubr.bf16.mxu0 %v2440_v0 }
  0xae   : > { %819 = vmatmul.mubr.bf16.gmra.mrb[40].mxu0 %v2039_v12 }
  0xaf   : > { %828 = vmatprep.mubr.bf16.mxu0 %v2440_v0 }
  0xb6   : > { %829 = vmatmul.mubr.bf16.gmra.mrb[44].mxu0 %v2040_v13 }
  0xb7   : > { %838 = vmatprep.mubr.bf16.mxu0 %v2440_v0 }
  0xb8   : > { %v353_v18 = vpop.permute.xlu0 %352 }
  0xbc   : > { %v358_v22 = vpop.permute.xlu0 %357 }
  0xbe   : > { %839 = vmatmul.mubr.bf16.gmra.mrb[48].mxu0 %v2041_v14 }
  0xbf   : > { %848 = vmatprep.mubr.bf16.mxu0 %v2440_v0 }
  0xc0   : > { %v373_v47 = vpop.permute.xlu0 %372 }
  0xc4   : > { %v383_v6 = vpop.permute.xlu0 %382 }
  0xc6   : > { %849 = vmatmul.mubr.bf16.gmra.mrb[52].mxu0 %v2042_v15 }
  0xc7   : > { %858 = vmatprep.mubr.bf16.mxu0 %v2440_v0 }
  0xce   : > { %859 = vmatmul.mubr.bf16.gmra.mrb[56].mxu0 %v2043_v16 }
  0xcf   : > { %868 = vmatprep.mubr.bf16.mxu0 %v2440_v0  ;;  %v363_v0 = vpop.permute.xlu1 %362 }
  0xd3   : > { %v368_v35 = vpop.permute.xlu1 %367 }
  0xd6   : > { %869 = vmatmul.mubr.bf16.gmra.mrb[60].mxu0 %v2044_v17 }
  0xd7   : > { %v378_v55 = vpop.permute.xlu1 %377 }
  0xdb   : > { %v388_v14 = vpop.permute.xlu1 %387 }
 0x131   : > { %v720_v19 = vpop.f32.mrb[0].mxu0 }
 0x132   : > { %v2800_v20 = vadd.f32 %v720_v19, %v353_v18  ;;  %v722_v21 = vpop.f32.mrb[1].mxu0 }
 0x133   : > { %v2802_v23 = vadd.f32 %v722_v21, %v353_v18  ;;  %v724_v24 = vpop.f32.mrb[2].mxu0 }
 0x134   : > { %v1845_v25 = vmul.f32 -1.442695, %v2800_v20  ;;  %v2805_v26 = vadd.f32 %v724_v24, %v358_v22  ;;  %v726_v27 = vpop.f32.mrb[3].mxu0 }
 0x135   : > { %v1846_v28 = vmul.f32 -1.442695, %v2802_v23  ;;  %v2808_v29 = vadd.f32 %v726_v27, %v358_v22 }
 0x136   : > { %2069 = vpow2.f32 %v1845_v25  ;;  %v1847_v30 = vmul.f32 -1.442695, %v2805_v26 }
 0x137   : > { %2071 = vpow2.f32 %v1846_v28  ;;  %v1848_v31 = vmul.f32 -1.442695, %v2808_v29 }
 0x138   : > { %2073 = vpow2.f32 %v1847_v30 }
 0x139   : > { %2075 = vpow2.f32 %v1848_v31  ;;  %v730_v32 = vpop.f32.mrb[4].mxu0 }
 0x13a   : > { %v2812_v33 = vadd.f32 %v730_v32, %v363_v0  ;;  %v732_v34 = vpop.f32.mrb[5].mxu0 }
 0x13b   : > { %v2814_v36 = vadd.f32 %v732_v34, %v363_v0  ;;  %v734_v37 = vpop.f32.mrb[6].mxu0 }
 0x13c   : > { %v1849_v38 = vmul.f32 -1.442695, %v2812_v33  ;;  %v2817_v39 = vadd.f32 %v734_v37, %v368_v35  ;;  %v736_v40 = vpop.f32.mrb[7].mxu0 }
 0x13d   : > { %v1850_v41 = vmul.f32 -1.442695, %v2814_v36  ;;  %v2820_v42 = vadd.f32 %v736_v40, %v368_v35 }
 0x13e   : > { %2077 = vpow2.f32 %v1849_v38  ;;  %v1851_v43 = vmul.f32 -1.442695, %v2817_v39  ;;  %v393_v38 = vpop.permute.xlu0 %392 }
 0x13f   : > { %2079 = vpow2.f32 %v1850_v41  ;;  %v1852_v44 = vmul.f32 -1.442695, %v2820_v42 }
 0x140   : > { %v2070_v45 = vpop.eup %2069  ;;  %2081 = vpow2.f32 %v1851_v43 }
 0x141   : > { %v2072_v46 = vpop.eup %2071  ;;  %v1071_v48 = vadd.f32 1.0, %v2070_v45  ;;  %2083 = vpow2.f32 %v1852_v44  ;;  %v740_v49 = vpop.f32.mrb[8].mxu0 }
 0x142   : > { %v2074_v50 = vpop.eup %2073  ;;  %v1072_v51 = vadd.f32 1.0, %v2072_v46  ;;  %v2824_v52 = vadd.f32 %v740_v49, %v373_v47  ;;  %v742_v53 = vpop.f32.mrb[9].mxu0 }
 0x143   : > { %v2076_v54 = vpop.eup %2075  ;;  %2085 = vrcp.f32 %v1071_v48  ;;  %v1073_v56 = vadd.f32 1.0, %v2074_v50  ;;  %v2826_v57 = vadd.f32 %v742_v53, %v373_v47  ;;  %v744_v58 = vpop.f32.mrb[10].mxu0 }
 0x144   : > { %2087 = vrcp.f32 %v1072_v51  ;;  %v1074_v59 = vadd.f32 1.0, %v2076_v54  ;;  %v1853_v60 = vmul.f32 -1.442695, %v2824_v52  ;;  %v2829_v61 = vadd.f32 %v744_v58, %v378_v55  ;;  %v746_v62 = vpop.f32.mrb[11].mxu0 }
 0x145   : > { %2089 = vrcp.f32 %v1073_v56  ;;  %v1854_v63 = vmul.f32 -1.442695, %v2826_v57  ;;  %v2832_v1 = vadd.f32 %v746_v62, %v378_v55 }
 0x146   : > { %2091 = vrcp.f32 %v1074_v59  ;;  %v1855_v2 = vmul.f32 -1.442695, %v2829_v61 }
 0x147   : > { %2093 = vpow2.f32 %v1853_v60  ;;  %v1856_v3 = vmul.f32 -1.442695, %v2832_v1 }
 0x148   : > { %v2078_v4 = vpop.eup %2077  ;;  %2095 = vpow2.f32 %v1854_v63  ;;  %v2047_v63 = vld [vmem:[#allocation2 + $0x4] ss:$8 sps:$4 sm:$0xff]  }
 0x149   : > { %v2080_v5 = vpop.eup %2079  ;;  %v1075_v7 = vadd.f32 1.0, %v2078_v4  ;;  %2097 = vpow2.f32 %v1855_v2  ;;  %v750_v8 = vpop.f32.mrb[12].mxu0  ;;  %1583 = vmatprep.mubr.bf16.mxu1 %v2047_v63 }
 0x14a   : > { %v2082_v9 = vpop.eup %2081  ;;  %v1076_v10 = vadd.f32 1.0, %v2080_v5  ;;  %2099 = vpow2.f32 %v1856_v3  ;;  %v2836_v11 = vadd.f32 %v750_v8, %v383_v6  ;;  %v752_v12 = vpop.f32.mrb[13].mxu0 }
 0x14b   : > { %v2084_v13 = vpop.eup %2083  ;;  %2101 = vrcp.f32 %v1075_v7  ;;  %v1077_v15 = vadd.f32 1.0, %v2082_v9  ;;  %v2838_v16 = vadd.f32 %v752_v12, %v383_v6  ;;  %v754_v17 = vpop.f32.mrb[14].mxu0 }
 0x14c   : > { %2103 = vrcp.f32 %v1076_v10  ;;  %v1078_v18 = vadd.f32 1.0, %v2084_v13  ;;  %v1857_v19 = vmul.f32 -1.442695, %v2836_v11  ;;  %v2841_v21 = vadd.f32 %v754_v17, %v388_v14  ;;  %v756_v22 = vpop.f32.mrb[15].mxu0  ;;  %v403_v10 = vpop.permute.xlu0 %402 }
 0x14d   : > { %v2086_v24 = vpop.eup %2085  ;;  %2105 = vrcp.f32 %v1077_v15  ;;  %v1858_v25 = vmul.f32 -1.442695, %v2838_v16  ;;  %v2844_v27 = vadd.f32 %v756_v22, %v388_v14 }
 0x14e   : > { %v2088_v0 = vpop.eup %2087  ;;  %2107 = vrcp.f32 %v1078_v18  ;;  %v1859_v28 = vmul.f32 -1.442695, %v2841_v21  ;;  %v1263_v34 = vmul.f32 %v2086_v24, %v2800_v20  ;;  %v398_v20 = vpop.permute.xlu1 %397 }
 0x14f   : > { %v2090_v30 = vpop.eup %2089  ;;  %2109 = vpow2.f32 %v1857_v19  ;;  %v1860_v31 = vmul.f32 -1.442695, %v2844_v27  ;;  %v1264_v41 = vmul.f32 %v2088_v0, %v2802_v23 }
 0x150   : > { %v2092_v32 = vpop.eup %2091  ;;  %v1265_v35 = vmul.f32 %v2090_v30, %v2805_v26  ;;  %2111 = vpow2.f32 %v1858_v25 }
 0x151   : > { %v2094_v37 = vpop.eup %2093  ;;  %2113 = vpow2.f32 %v1859_v28  ;;  %v760_v40 = vpop.f32.mrb[16].mxu0  ;;  %v1266_v43 = vmul.f32 %v2092_v32, %v2808_v29 }
 0x152   : > { %v2096_v44 = vpop.eup %2095  ;;  %v1079_v45 = vadd.f32 1.0, %v2094_v37  ;;  %2115 = vpow2.f32 %v1860_v31  ;;  %v2852_v46 = vadd.f32 %v760_v40, %v393_v38  ;;  %v762_v47 = vpop.f32.mrb[17].mxu0  ;;  %v1343_v48 = vpack.c.bf16 %v1265_v35, %v1263_v34 }
 0x153   : > { %v2098_v49 = vpop.eup %2097  ;;  %v1080_v50 = vadd.f32 1.0, %v2096_v44  ;;  %v2854_v26 = vadd.f32 %v762_v47, %v393_v38  ;;  %v764_v51 = vpop.f32.mrb[18].mxu0  ;;  %v1344_v53 = vpack.c.bf16 %v1266_v43, %v1264_v41 }
 0x154   : > { %v2100_v54 = vpop.eup %2099  ;;  %2117 = vrcp.f32 %v1079_v45  ;;  %v1081_v55 = vadd.f32 1.0, %v2098_v49  ;;  %v1861_v23 = vmul.f32 -1.442695, %v2852_v46  ;;  %v2857_v29 = vadd.f32 %v764_v51, %v398_v20  ;;  %v766_v56 = vpop.f32.mrb[19].mxu0 }
 0x155   : > { %v2102_v58 = vpop.eup %2101  ;;  %2119 = vrcp.f32 %v1080_v50  ;;  %v1082_v59 = vadd.f32 1.0, %v2100_v54  ;;  %v1862_v60 = vmul.f32 -1.442695, %v2854_v26  ;;  %v2860_v62 = vadd.f32 %v766_v56, %v398_v20  ;;  %1551 = vmatprep.subr.bf16.mxu1 %v1344_v53  ;;  %v413_v47 = vpop.permute.xlu0 %412 }
 0x156   : > { %v2104_v2 = vpop.eup %2103  ;;  %2121 = vrcp.f32 %v1081_v55  ;;  %v1863_v3 = vmul.f32 -1.442695, %v2857_v29  ;;  %1552 = vmatpush1.bf16.msra.mxu1 %v1343_v48  ;;  %v1267_v7 = vmul.f32 %v2102_v58, %v2812_v33  ;;  %v408_v33 = vpop.permute.xlu1 %407 }
 0x157   : > { %v2106_v4 = vpop.eup %2105  ;;  %2123 = vrcp.f32 %v1082_v59  ;;  %v1864_v5 = vmul.f32 -1.442695, %v2860_v62  ;;  %v1268_v12 = vmul.f32 %v2104_v2, %v2814_v36 }
 0x158   : > { %v2108_v6 = vpop.eup %2107  ;;  %v1269_v8 = vmul.f32 %v2106_v4, %v2817_v39  ;;  %2125 = vpow2.f32 %v1861_v23 }
 0x159   : > { %v2110_v9 = vpop.eup %2109  ;;  %v1270_v13 = vmul.f32 %v2108_v6, %v2820_v42  ;;  %2127 = vpow2.f32 %v1862_v60  ;;  %v770_v14 = vpop.f32.mrb[20].mxu0 }
 0x15a   : > { %v2112_v15 = vpop.eup %2111  ;;  %v1083_v17 = vadd.f32 1.0, %v2110_v9  ;;  %2129 = vpow2.f32 %v1863_v3  ;;  %v2868_v18 = vadd.f32 %v770_v14, %v403_v10  ;;  %v772_v19 = vpop.f32.mrb[21].mxu0  ;;  %v1345_v22 = vpack.c.bf16 %v1269_v8, %v1267_v7 }
 0x15b   : > { %v2114_v24 = vpop.eup %2113  ;;  %v1084_v25 = vadd.f32 1.0, %v2112_v15  ;;  %2131 = vpow2.f32 %v1864_v5  ;;  %v2870_v39 = vadd.f32 %v772_v19, %v403_v10  ;;  %v774_v0 = vpop.f32.mrb[22].mxu0  ;;  %v1346_v28 = vpack.c.bf16 %v1270_v13, %v1268_v12 }
 0x15c   : > { %v2116_v36 = vpop.eup %2115  ;;  %2133 = vrcp.f32 %v1083_v17  ;;  %v1085_v42 = vadd.f32 1.0, %v2114_v24  ;;  %v1865_v30 = vmul.f32 -1.442695, %v2868_v18  ;;  %v2873_v31 = vadd.f32 %v774_v0, %v408_v33  ;;  %v776_v32 = vpop.f32.mrb[23].mxu0 }
 0x15d   : > { %2135 = vrcp.f32 %v1084_v25  ;;  %v1086_v34 = vadd.f32 1.0, %v2116_v36  ;;  %v1866_v35 = vmul.f32 -1.442695, %v2870_v39  ;;  %v2876_v37 = vadd.f32 %v776_v32, %v408_v33  ;;  %1553 = vmatprep.subr.bf16.mxu1 %v1346_v28  ;;  %v418_v56 = vpop.permute.xlu1 %417  ;;  %v423_v17 = vpop.permute.xlu0 %422 }
 0x15e   : > { %v2118_v38 = vpop.eup %2117  ;;  %2137 = vrcp.f32 %v1085_v42  ;;  %v1867_v40 = vmul.f32 -1.442695, %v2873_v31  ;;  %1554 = vmatpush1.bf16.msra.mxu1 %v1345_v22 }
 0x15f   : > { %v2120_v41 = vpop.eup %2119  ;;  %2139 = vrcp.f32 %v1086_v34  ;;  %v1868_v43 = vmul.f32 -1.442695, %v2876_v37  ;;  %v1271_v48 = vmul.f32 %v2118_v38, %v2824_v52 }
 0x160   : > { %v2122_v44 = vpop.eup %2121  ;;  %2141 = vpow2.f32 %v1865_v30  ;;  %v1272_v51 = vmul.f32 %v2120_v41, %v2826_v57 }
 0x161   : > { %v2124_v45 = vpop.eup %2123  ;;  %v1273_v49 = vmul.f32 %v2122_v44, %v2829_v61  ;;  %2143 = vpow2.f32 %v1866_v35  ;;  %v780_v20 = vpop.f32.mrb[24].mxu0 }
 0x162   : > { %v2126_v50 = vpop.eup %2125  ;;  %v1274_v53 = vmul.f32 %v2124_v45, %v2832_v1  ;;  %2145 = vpow2.f32 %v1867_v40  ;;  %v2884_v54 = vadd.f32 %v780_v20, %v413_v47  ;;  %v782_v55 = vpop.f32.mrb[25].mxu0 }
 0x163   : > { %v2128_v23 = vpop.eup %2127  ;;  %v1087_v58 = vadd.f32 1.0, %v2126_v50  ;;  %2147 = vpow2.f32 %v1868_v43  ;;  %v2886_v59 = vadd.f32 %v782_v55, %v413_v47  ;;  %v784_v52 = vpop.f32.mrb[26].mxu0  ;;  %v1347_v60 = vpack.c.bf16 %v1273_v49, %v1271_v48 }
 0x164   : > { %v2130_v61 = vpop.eup %2129  ;;  %v1088_v63 = vadd.f32 1.0, %v2128_v23  ;;  %v2888_v2 = vadd.f32 %v784_v52, %v418_v56  ;;  %v786_v3 = vpop.f32.mrb[27].mxu0  ;;  %v1348_v57 = vpack.c.bf16 %v1274_v53, %v1272_v51  ;;  %v1869_v5 = vmul.f32 -1.442695, %v2884_v54 }
 0x165   : > { %v2132_v4 = vpop.eup %2131  ;;  %2149 = vrcp.f32 %v1087_v58  ;;  %v1089_v1 = vadd.f32 1.0, %v2130_v61  ;;  %v2891_v6 = vadd.f32 %v786_v3, %v418_v56  ;;  %v1870_v9 = vmul.f32 -1.442695, %v2886_v59  ;;  %v428_v42 = vpop.permute.xlu1 %427 }
 0x166   : > { %v2134_v7 = vpop.eup %2133  ;;  %2151 = vrcp.f32 %v1088_v63  ;;  %v1090_v8 = vadd.f32 1.0, %v2132_v4  ;;  %1555 = vmatprep.subr.bf16.mxu1 %v1348_v57  ;;  %v1871_v12 = vmul.f32 -1.442695, %v2888_v2  ;;  %v433_v55 = vpop.permute.xlu0 %432 }
 0x167   : > { %v2136_v10 = vpop.eup %2135  ;;  %2153 = vrcp.f32 %v1089_v1  ;;  %1556 = vmatpush1.bf16.msra.mxu1 %v1347_v60  ;;  %v1872_v14 = vmul.f32 -1.442695, %v2891_v6  ;;  %v1275_v19 = vmul.f32 %v2134_v7, %v2836_v11 }
 0x168   : > { %v2138_v13 = vpop.eup %2137  ;;  %2155 = vrcp.f32 %v1090_v8 }
 0x169   : > { %v2140_v15 = vpop.eup %2139  ;;  %v1277_v22 = vmul.f32 %v2138_v13, %v2841_v21  ;;  %2157 = vpow2.f32 %v1869_v5  ;;  %v790_v24 = vpop.f32.mrb[28].mxu0  ;;  %v1276_v21 = vmul.f32 %v2136_v10, %v2838_v16 }
 0x16a   : > { %v2142_v33 = vpop.eup %2141  ;;  %v1278_v25 = vmul.f32 %v2140_v15, %v2844_v27  ;;  %2159 = vpow2.f32 %v1870_v9  ;;  %v2899_v0 = vadd.f32 %v790_v24, %v423_v17  ;;  %v792_v28 = vpop.f32.mrb[29].mxu0 }
 0x16b   : > { %v2144_v36 = vpop.eup %2143  ;;  %v1091_v30 = vadd.f32 1.0, %v2142_v33  ;;  %2161 = vpow2.f32 %v1871_v12  ;;  %v2901_v32 = vadd.f32 %v792_v28, %v423_v17  ;;  %v794_v34 = vpop.f32.mrb[30].mxu0  ;;  %v1349_v35 = vpack.c.bf16 %v1277_v22, %v1275_v19 }
 0x16c   : > { %v2146_v11 = vpop.eup %2145  ;;  %v1092_v38 = vadd.f32 1.0, %v2144_v36  ;;  %2163 = vpow2.f32 %v1872_v14  ;;  %v2904_v40 = vadd.f32 %v794_v34, %v428_v42  ;;  %v796_v27 = vpop.f32.mrb[31].mxu0  ;;  %v1873_v44 = vmul.f32 -1.442695, %v2899_v0 }
 0x16d   : > { %v2148_v41 = vpop.eup %2147  ;;  %2165 = vrcp.f32 %v1091_v30  ;;  %v1093_v43 = vadd.f32 1.0, %v2146_v11  ;;  %v2907_v45 = vadd.f32 %v796_v27, %v428_v42  ;;  %v1874_v48 = vmul.f32 -1.442695, %v2901_v32  ;;  %v438_v63 = vpop.permute.xlu1 %437 }
 0x16e   : > { %2167 = vrcp.f32 %v1092_v38  ;;  %v1094_v47 = vadd.f32 1.0, %v2148_v41  ;;  %v1350_v49 = vpack.c.bf16 %v1278_v25, %v1276_v21  ;;  %v1875_v16 = vmul.f32 -1.442695, %v2904_v40  ;;  %v443_v28 = vpop.permute.xlu0 %442 }
 0x16f   : > { %v2150_v20 = vpop.eup %2149  ;;  %2169 = vrcp.f32 %v1093_v43  ;;  %v1876_v51 = vmul.f32 -1.442695, %v2907_v45 }
 0x170   : > { %v2152_v50 = vpop.eup %2151  ;;  %2171 = vrcp.f32 %v1094_v47  ;;  %1557 = vmatprep.subr.bf16.mxu1 %v1350_v49  ;;  %v1279_v7 = vmul.f32 %v2150_v20, %v2852_v46 }
 0x171   : > { %v2154_v53 = vpop.eup %2153  ;;  %2173 = vpow2.f32 %v1873_v44  ;;  %1558 = vmatpush1.bf16.msra.mxu1 %v1349_v35  ;;  %v800_v23 = vpop.f32.mrb[32].mxu0  ;;  %v1280_v3 = vmul.f32 %v2152_v50, %v2854_v26 }
 0x172   : > { %v2156_v56 = vpop.eup %2155  ;;  %v1281_v58 = vmul.f32 %v2154_v53, %v2857_v29  ;;  %2175 = vpow2.f32 %v1874_v48  ;;  %v2913_v52 = vadd.f32 %v800_v23, %v433_v55  ;;  %v802_v60 = vpop.f32.mrb[33].mxu0 }
 0x173   : > { %v2158_v61 = vpop.eup %2157  ;;  %v1282_v57 = vmul.f32 %v2156_v56, %v2860_v62  ;;  %2177 = vpow2.f32 %v1875_v16  ;;  %v2917_v4 = vadd.f32 %v802_v60, %v433_v55  ;;  %v804_v1 = vpop.f32.mrb[34].mxu0 }
 0x174   : > { %v2160_v5 = vpop.eup %2159  ;;  %v1095_v8 = vadd.f32 1.0, %v2158_v61  ;;  %2179 = vpow2.f32 %v1876_v51  ;;  %v2920_v29 = vadd.f32 %v804_v1, %v438_v63  ;;  %v806_v9 = vpop.f32.mrb[35].mxu0  ;;  %v1877_v15 = vmul.f32 -1.442695, %v2913_v52 }
 0x175   : > { %v2162_v10 = vpop.eup %2161  ;;  %v1096_v12 = vadd.f32 1.0, %v2160_v5  ;;  %v2922_v13 = vadd.f32 %v806_v9, %v438_v63  ;;  %v1352_v14 = vpack.c.bf16 %v1282_v57, %v1280_v3  ;;  %v1351_v17 = vpack.c.bf16 %v1281_v58, %v1279_v7  ;;  %v448_v21 = vpop.permute.xlu1 %447 }
 0x176   : > { %v2164_v26 = vpop.eup %2163  ;;  %2181 = vrcp.f32 %v1095_v8  ;;  %v1097_v62 = vadd.f32 1.0, %v2162_v10  ;;  %v1878_v46 = vmul.f32 -1.442695, %v2917_v4  ;;  %v1879_v33 = vmul.f32 -1.442695, %v2920_v29  ;;  %v453_v63 = vpop.permute.xlu0 %452 }
 0x177   : > { %v2166_v19 = vpop.eup %2165  ;;  %2183 = vrcp.f32 %v1096_v12  ;;  %v1098_v22 = vadd.f32 1.0, %v2164_v26  ;;  %1559 = vmatprep.subr.bf16.mxu1 %v1352_v14  ;;  %v1880_v36 = vmul.f32 -1.442695, %v2922_v13 }
 0x178   : > { %v2168_v24 = vpop.eup %2167  ;;  %2185 = vrcp.f32 %v1097_v62  ;;  %1560 = vmatpush1.bf16.msra.mxu1 %v1351_v17  ;;  %v1283_v50 = vmul.f32 %v2166_v19, %v2868_v18 }
 0x179   : > { %v2170_v25 = vpop.eup %2169  ;;  %2187 = vrcp.f32 %v1098_v22  ;;  %v810_v42 = vpop.f32.mrb[36].mxu0  ;;  %v1284_v47 = vmul.f32 %v2168_v24, %v2870_v39 }
 0x17a   : > { %v2172_v30 = vpop.eup %2171  ;;  %2189 = vpow2.f32 %v1877_v15  ;;  %v2928_v34 = vadd.f32 %v810_v42, %v443_v28  ;;  %v812_v35 = vpop.f32.mrb[37].mxu0  ;;  %v1285_v38 = vmul.f32 %v2170_v25, %v2873_v31 }
 0x17b   : > { %v2174_v11 = vpop.eup %2173  ;;  %v1286_v27 = vmul.f32 %v2172_v30, %v2876_v37  ;;  %2191 = vpow2.f32 %v1878_v46  ;;  %v2932_v41 = vadd.f32 %v812_v35, %v443_v28  ;;  %v814_v43 = vpop.f32.mrb[38].mxu0 }
 0x17c   : > { %v2176_v44 = vpop.eup %2175  ;;  %v1099_v48 = vadd.f32 1.0, %v2174_v11  ;;  %2193 = vpow2.f32 %v1879_v33  ;;  %v2935_v49 = vadd.f32 %v814_v43, %v448_v21  ;;  %v816_v20 = vpop.f32.mrb[39].mxu0  ;;  %v1881_v55 = vmul.f32 -1.442695, %v2928_v34 }
 0x17d   : > { %v2178_v16 = vpop.eup %2177  ;;  %v1100_v51 = vadd.f32 1.0, %v2176_v44  ;;  %2195 = vpow2.f32 %v1880_v36  ;;  %v2938_v31 = vadd.f32 %v816_v20, %v448_v21  ;;  %v1354_v23 = vpack.c.bf16 %v1286_v27, %v1284_v47  ;;  %v458_v9 = vpop.permute.xlu1 %457 }
 0x17e   : > { %v2180_v37 = vpop.eup %2179  ;;  %2197 = vrcp.f32 %v1099_v48  ;;  %v1101_v53 = vadd.f32 1.0, %v2178_v16  ;;  %v1882_v56 = vmul.f32 -1.442695, %v2932_v41  ;;  %v1353_v58 = vpack.c.bf16 %v1285_v38, %v1283_v50  ;;  %v463_v38 = vpop.permute.xlu0 %462 }
 0x17f   : > { %2199 = vrcp.f32 %v1100_v51  ;;  %v1102_v39 = vadd.f32 1.0, %v2180_v37  ;;  %v1883_v61 = vmul.f32 -1.442695, %v2935_v49  ;;  %1561 = vmatprep.subr.bf16.mxu1 %v1354_v23  ;;  %v1884_v3 = vmul.f32 -1.442695, %v2938_v31 }
 0x180   : > { %v2182_v60 = vpop.eup %2181  ;;  %2201 = vrcp.f32 %v1101_v53  ;;  %1562 = vmatpush1.bf16.msra.mxu1 %v1353_v58 }
 0x181   : > { %v2184_v18 = vpop.eup %2183  ;;  %2203 = vrcp.f32 %v1102_v39  ;;  %v820_v57 = vpop.f32.mrb[40].mxu0  ;;  %v1287_v24 = vmul.f32 %v2182_v60, %v2884_v54 }
 0x182   : > { %v2186_v1 = vpop.eup %2185  ;;  %2205 = vpow2.f32 %v1881_v55  ;;  %v2944_v5 = vadd.f32 %v820_v57, %v453_v63  ;;  %v822_v7 = vpop.f32.mrb[41].mxu0  ;;  %v1288_v10 = vmul.f32 %v2184_v18, %v2886_v59 }
 0x183   : > { %v2188_v8 = vpop.eup %2187  ;;  %v1289_v12 = vmul.f32 %v2186_v1, %v2888_v2  ;;  %2207 = vpow2.f32 %v1882_v56  ;;  %v2948_v14 = vadd.f32 %v822_v7, %v453_v63  ;;  %v824_v26 = vpop.f32.mrb[42].mxu0 }
 0x184   : > { %v2190_v62 = vpop.eup %2189  ;;  %v1290_v15 = vmul.f32 %v2188_v8, %v2891_v6  ;;  %2209 = vpow2.f32 %v1883_v61  ;;  %v1885_v17 = vmul.f32 -1.442695, %v2944_v5  ;;  %v2952_v19 = vadd.f32 %v824_v26, %v458_v9  ;;  %v826_v22 = vpop.f32.mrb[43].mxu0 }
 0x185   : > { %v2192_v46 = vpop.eup %2191  ;;  %v1103_v33 = vadd.f32 1.0, %v2190_v62  ;;  %2211 = vpow2.f32 %v1884_v3  ;;  %v2955_v59 = vadd.f32 %v826_v22, %v458_v9  ;;  %v1886_v42 = vmul.f32 -1.442695, %v2948_v14  ;;  %v468_v53 = vpop.permute.xlu1 %467 }
 0x186   : > { %v2194_v2 = vpop.eup %2193  ;;  %v1104_v25 = vadd.f32 1.0, %v2192_v46  ;;  %2213 = vpow2.f32 %v1885_v17  ;;  %v1356_v28 = vpack.c.bf16 %v1290_v15, %v1288_v10  ;;  %v1355_v30 = vpack.c.bf16 %v1289_v12, %v1287_v24  ;;  %v473_v10 = vpop.permute.xlu0 %472 }
 0x187   : > { %v2196_v36 = vpop.eup %2195  ;;  %2215 = vrcp.f32 %v1103_v33  ;;  %v1105_v6 = vadd.f32 1.0, %v2194_v2  ;;  %v1887_v21 = vmul.f32 -1.442695, %v2952_v19  ;;  %v1888_v27 = vmul.f32 -1.442695, %v2955_v59 }
 0x188   : > { %v2198_v35 = vpop.eup %2197  ;;  %2217 = vrcp.f32 %v1104_v25  ;;  %v1106_v11 = vadd.f32 1.0, %v2196_v36  ;;  %1563 = vmatprep.subr.bf16.mxu1 %v1356_v28 }
 0x189   : > { %v2200_v54 = vpop.eup %2199  ;;  %2219 = vrcp.f32 %v1105_v6  ;;  %1564 = vmatpush1.bf16.msra.mxu1 %v1355_v30  ;;  %v830_v43 = vpop.f32.mrb[44].mxu0  ;;  %v1291_v60 = vmul.f32 %v2198_v35, %v2899_v0 }
 0x18a   : > { %v2202_v44 = vpop.eup %2201  ;;  %2221 = vrcp.f32 %v1106_v11  ;;  %v2960_v47 = vadd.f32 %v830_v43, %v463_v38  ;;  %v832_v48 = vpop.f32.mrb[45].mxu0  ;;  %v1292_v16 = vmul.f32 %v2200_v54, %v2901_v32 }
 0x18b   : > { %v2204_v20 = vpop.eup %2203  ;;  %v1293_v50 = vmul.f32 %v2202_v44, %v2904_v40  ;;  %2223 = vpow2.f32 %v1886_v42  ;;  %v834_v51 = vpop.f32.mrb[46].mxu0  ;;  %v2966_v39 = vadd.f32 %v832_v48, %v463_v38 }
 0x18c   : > { %v2206_v37 = vpop.eup %2205  ;;  %v1294_v55 = vmul.f32 %v2204_v20, %v2907_v45  ;;  %2225 = vpow2.f32 %v1887_v21  ;;  %v1889_v23 = vmul.f32 -1.442695, %v2960_v47  ;;  %v836_v56 = vpop.f32.mrb[47].mxu0  ;;  %v2969_v32 = vadd.f32 %v834_v51, %v468_v53 }
 0x18d   : > { %v2208_v58 = vpop.eup %2207  ;;  %v1107_v61 = vadd.f32 1.0, %v2206_v37  ;;  %2227 = vpow2.f32 %v1888_v27  ;;  %v2971_v63 = vadd.f32 %v836_v56, %v468_v53  ;;  %v1357_v1 = vpack.c.bf16 %v1293_v50, %v1291_v60  ;;  %v478_v28 = vpop.permute.xlu1 %477 }
 0x18e   : > { %v2210_v40 = vpop.eup %2209  ;;  %v1108_v18 = vadd.f32 1.0, %v2208_v58  ;;  %2229 = vpow2.f32 %v1889_v23  ;;  %v1358_v3 = vpack.c.bf16 %v1294_v55, %v1292_v16  ;;  %v1890_v9 = vmul.f32 -1.442695, %v2966_v39 }
 0x18f   : > { %v2212_v45 = vpop.eup %2211  ;;  %2231 = vrcp.f32 %v1107_v61  ;;  %v1109_v57 = vadd.f32 1.0, %v2210_v40  ;;  %v1891_v26 = vmul.f32 -1.442695, %v2969_v32  ;;  %v1892_v17 = vmul.f32 -1.442695, %v2971_v63 }
 0x190   : > { %v2214_v7 = vpop.eup %2213  ;;  %2233 = vrcp.f32 %v1108_v18  ;;  %v1110_v8 = vadd.f32 1.0, %v2212_v45  ;;  %1565 = vmatprep.subr.bf16.mxu1 %v1358_v3 }
 0x191   : > { %v2216_v0 = vpop.eup %2215  ;;  %2235 = vrcp.f32 %v1109_v57  ;;  %v1111_v12 = vadd.f32 1.0, %v2214_v7  ;;  %1566 = vmatpush1.bf16.msra.mxu1 %v1357_v1  ;;  %v840_v62 = vpop.f32.mrb[48].mxu0 }
 0x192   : > { %v2218_v15 = vpop.eup %2217  ;;  %2237 = vrcp.f32 %v1110_v8  ;;  %v2976_v22 = vadd.f32 %v840_v62, %v473_v10  ;;  %v842_v46 = vpop.f32.mrb[49].mxu0  ;;  %v1295_v33 = vmul.f32 %v2216_v0, %v2913_v52 }
 0x193   : > { %v2220_v24 = vpop.eup %2219  ;;  %2239 = vrcp.f32 %v1111_v12  ;;  %v844_v2 = vpop.f32.mrb[50].mxu0  ;;  %v2981_v42 = vadd.f32 %v842_v46, %v473_v10  ;;  %v1296_v11 = vmul.f32 %v2218_v15, %v2917_v4 }
 0x194   : > { %v2222_v25 = vpop.eup %2221  ;;  %v1297_v36 = vmul.f32 %v2220_v24, %v2920_v29  ;;  %2241 = vpow2.f32 %v1890_v9  ;;  %v1893_v6 = vmul.f32 -1.442695, %v2976_v22  ;;  %v846_v30 = vpop.f32.mrb[51].mxu0  ;;  %v2985_v54 = vadd.f32 %v844_v2, %v478_v28 }
 0x195   : > { %v2224_v35 = vpop.eup %2223  ;;  %v1298_v21 = vmul.f32 %v2222_v25, %v2922_v13  ;;  %2243 = vpow2.f32 %v1891_v26  ;;  %v2987_v27 = vadd.f32 %v846_v30, %v478_v28  ;;  %v1894_v4 = vmul.f32 -1.442695, %v2981_v42  ;;  %v483_v13 = vpop.permute.xlu0 %482 }
 0x196   : > { %v2226_v52 = vpop.eup %2225  ;;  %v1112_v38 = vadd.f32 1.0, %v2224_v35  ;;  %2245 = vpow2.f32 %v1892_v17  ;;  %v1359_v29 = vpack.c.bf16 %v1297_v36, %v1295_v33  ;;  %v1895_v37 = vmul.f32 -1.442695, %v2985_v54  ;;  %v488_v45 = vpop.permute.xlu1 %487 }
 0x197   : > { %v2228_v43 = vpop.eup %2227  ;;  %v1113_v44 = vadd.f32 1.0, %v2226_v52  ;;  %2247 = vpow2.f32 %v1893_v6  ;;  %v1360_v48 = vpack.c.bf16 %v1298_v21, %v1296_v11  ;;  %v1896_v23 = vmul.f32 -1.442695, %v2987_v27 }
 0x198   : > { %v2230_v20 = vpop.eup %2229  ;;  %2249 = vrcp.f32 %v1112_v38  ;;  %v1114_v16 = vadd.f32 1.0, %v2228_v43 }
 0x199   : > { %v2232_v50 = vpop.eup %2231  ;;  %2251 = vrcp.f32 %v1113_v44  ;;  %v1115_v51 = vadd.f32 1.0, %v2230_v20  ;;  %1567 = vmatprep.subr.bf16.mxu1 %v1360_v48  ;;  %v850_v53 = vpop.f32.mrb[52].mxu0 }
 0x19a   : > { %v2234_v55 = vpop.eup %2233  ;;  %2253 = vrcp.f32 %v1114_v16  ;;  %1568 = vmatpush1.bf16.msra.mxu1 %v1359_v29  ;;  %v2992_v56 = vadd.f32 %v850_v53, %v483_v13  ;;  %v852_v58 = vpop.f32.mrb[53].mxu0  ;;  %v1299_v61 = vmul.f32 %v2232_v50, %v2928_v34 }
 0x19b   : > { %v2236_v60 = vpop.eup %2235  ;;  %2255 = vrcp.f32 %v1115_v51  ;;  %v2995_v40 = vadd.f32 %v852_v58, %v483_v13  ;;  %v854_v18 = vpop.f32.mrb[54].mxu0  ;;  %v1300_v57 = vmul.f32 %v2234_v55, %v2932_v41 }
 0x19c   : > { %v2238_v3 = vpop.eup %2237  ;;  %v1301_v1 = vmul.f32 %v2236_v60, %v2935_v49  ;;  %2257 = vpow2.f32 %v1894_v4  ;;  %v1897_v7 = vmul.f32 -1.442695, %v2992_v56  ;;  %v856_v8 = vpop.f32.mrb[55].mxu0  ;;  %v3002_v10 = vadd.f32 %v854_v18, %v488_v45 }
 0x19d   : > { %v2240_v9 = vpop.eup %2239  ;;  %v1302_v0 = vmul.f32 %v2238_v3, %v2938_v31  ;;  %2259 = vpow2.f32 %v1895_v37  ;;  %v1898_v34 = vmul.f32 -1.442695, %v2995_v40  ;;  %v3004_v26 = vadd.f32 %v856_v8, %v488_v45  ;;  %v493_v33 = vpop.permute.xlu0 %492 }
 0x19e   : > { %v2242_v12 = vpop.eup %2241  ;;  %2261 = vpow2.f32 %v1896_v23  ;;  %v1361_v62 = vpack.c.bf16 %v1301_v1, %v1299_v61  ;;  %v1899_v2 = vmul.f32 -1.442695, %v3002_v10  ;;  %v1303_v29 = vmul.f32 %v2240_v9, %v2944_v5  ;;  %v498_v16 = vpop.permute.xlu1 %497 }
 0x19f   : > { %v2244_v41 = vpop.eup %2243  ;;  %v1116_v15 = vadd.f32 1.0, %v2242_v12  ;;  %2263 = vpow2.f32 %v1897_v7  ;;  %v1362_v49 = vpack.c.bf16 %v1302_v0, %v1300_v57  ;;  %v1900_v6 = vmul.f32 -1.442695, %v3004_v26 }
 0x1a0   : > { %v2246_v17 = vpop.eup %2245  ;;  %v1117_v46 = vadd.f32 1.0, %v2244_v41  ;;  %2265 = vpow2.f32 %v1898_v34 }
 0x1a1   : > { %v2248_v24 = vpop.eup %2247  ;;  %2267 = vrcp.f32 %v1116_v15  ;;  %v1118_v31 = vadd.f32 1.0, %v2246_v17  ;;  %1569 = vmatprep.subr.bf16.mxu1 %v1362_v49  ;;  %v860_v25 = vpop.f32.mrb[56].mxu0 }
 0x1a2   : > { %v2250_v28 = vpop.eup %2249  ;;  %2269 = vrcp.f32 %v1117_v46  ;;  %v1119_v36 = vadd.f32 1.0, %v2248_v24  ;;  %1570 = vmatpush1.bf16.msra.mxu1 %v1361_v62  ;;  %v3008_v30 = vadd.f32 %v860_v25, %v493_v33  ;;  %v862_v35 = vpop.f32.mrb[57].mxu0 }
 0x1a3   : > { %v2252_v11 = vpop.eup %2251  ;;  %2271 = vrcp.f32 %v1118_v31  ;;  %v3010_v21 = vadd.f32 %v862_v35, %v493_v33  ;;  %v864_v52 = vpop.f32.mrb[58].mxu0  ;;  %v1304_v4 = vmul.f32 %v2250_v28, %v2948_v14 }
 0x1a4   : > { %v2254_v38 = vpop.eup %2253  ;;  %v1305_v43 = vmul.f32 %v2252_v11, %v2952_v19  ;;  %2273 = vrcp.f32 %v1119_v36  ;;  %v1901_v44 = vmul.f32 -1.442695, %v3008_v30  ;;  %v866_v48 = vpop.f32.mrb[59].mxu0  ;;  %v3018_v37 = vadd.f32 %v864_v52, %v498_v16 }
 0x1a5   : > { %v2256_v20 = vpop.eup %2255  ;;  %v1306_v50 = vmul.f32 %v2254_v38, %v2955_v59  ;;  %2275 = vpow2.f32 %v1899_v2  ;;  %v1902_v13 = vmul.f32 -1.442695, %v3010_v21  ;;  %v3020_v55 = vadd.f32 %v866_v48, %v498_v16  ;;  %v503_v61 = vpop.permute.xlu0 %502 }
 0x1a6   : > { %v2258_v51 = vpop.eup %2257  ;;  %2277 = vpow2.f32 %v1900_v6  ;;  %v1363_v5 = vpack.c.bf16 %v1305_v43, %v1303_v29  ;;  %v1903_v57 = vmul.f32 -1.442695, %v3018_v37  ;;  %v508_v17 = vpop.permute.xlu1 %507  ;;  %v1307_v46 = vmul.f32 %v2256_v20, %v2960_v47 }
 0x1a7   : > { %v2260_v53 = vpop.eup %2259  ;;  %v1120_v19 = vadd.f32 1.0, %v2258_v51  ;;  %2279 = vpow2.f32 %v1901_v44  ;;  %v1364_v23 = vpack.c.bf16 %v1306_v50, %v1304_v4  ;;  %v1904_v0 = vmul.f32 -1.442695, %v3020_v55 }
 0x1a8   : > { %v2262_v58 = vpop.eup %2261  ;;  %v1121_v60 = vadd.f32 1.0, %v2260_v53  ;;  %2281 = vpow2.f32 %v1902_v13 }
 0x1a9   : > { %v2264_v14 = vpop.eup %2263  ;;  %2283 = vrcp.f32 %v1120_v19  ;;  %v1122_v59 = vadd.f32 1.0, %v2262_v58  ;;  %1571 = vmatprep.subr.bf16.mxu1 %v1364_v23  ;;  %v870_v18 = vpop.f32.mrb[60].mxu0 }
 0x1aa   : > { %v2266_v3 = vpop.eup %2265  ;;  %2285 = vrcp.f32 %v1121_v60  ;;  %v1123_v45 = vadd.f32 1.0, %v2264_v14  ;;  %1572 = vmatpush1.bf16.msra.mxu1 %v1363_v5  ;;  %v3023_v1 = vadd.f32 %v870_v18, %v503_v61  ;;  %v872_v7 = vpop.f32.mrb[61].mxu0 }
 0x1ab   : > { %v2268_v8 = vpop.eup %2267  ;;  %2287 = vrcp.f32 %v1122_v59  ;;  %v1124_v9 = vadd.f32 1.0, %v2266_v3  ;;  %v3026_v34 = vadd.f32 %v872_v7, %v503_v61  ;;  %v874_v12 = vpop.f32.mrb[62].mxu0 }
 0x1ac   : > { %v2270_v62 = vpop.eup %2269  ;;  %2289 = vrcp.f32 %v1123_v45  ;;  %v1905_v41 = vmul.f32 -1.442695, %v3023_v1  ;;  %v876_v15 = vpop.f32.mrb[63].mxu0  ;;  %v1308_v2 = vmul.f32 %v2268_v8, %v2966_v39  ;;  %v3034_v28 = vadd.f32 %v874_v12, %v508_v17 }
 0x1ad   : > { %v2272_v49 = vpop.eup %2271  ;;  %v1309_v24 = vmul.f32 %v2270_v62, %v2969_v32  ;;  %2291 = vrcp.f32 %v1124_v9  ;;  %v1906_v33 = vmul.f32 -1.442695, %v3026_v34  ;;  %v3036_v6 = vadd.f32 %v876_v15, %v508_v17 }
 0x1ae   : > { %v2274_v31 = vpop.eup %2273  ;;  %v1310_v25 = vmul.f32 %v2272_v49, %v2971_v63  ;;  %2293 = vpow2.f32 %v1903_v57  ;;  %v1907_v39 = vmul.f32 -1.442695, %v3034_v28 }
 0x1af   : > { %v2276_v36 = vpop.eup %2275  ;;  %2295 = vpow2.f32 %v1904_v0  ;;  %v1365_v35 = vpack.c.bf16 %v1309_v24, %v1307_v46  ;;  %v1908_v43 = vmul.f32 -1.442695, %v3036_v6  ;;  %v1311_v20 = vmul.f32 %v2274_v31, %v2976_v22 }
 0x1b0   : > { %v2278_v11 = vpop.eup %2277  ;;  %v1125_v47 = vadd.f32 1.0, %v2276_v36  ;;  %2297 = vpow2.f32 %v1905_v41  ;;  %v1366_v32 = vpack.c.bf16 %v1310_v25, %v1308_v2 }
 0x1b1   : > { %v2280_v52 = vpop.eup %2279  ;;  %v1126_v38 = vadd.f32 1.0, %v2278_v11  ;;  %2299 = vpow2.f32 %v1906_v33 }
 0x1b2   : > { %v2282_v29 = vpop.eup %2281  ;;  %2301 = vrcp.f32 %v1125_v47  ;;  %1573 = vmatprep.subr.bf16.mxu1 %v1366_v32  ;;  %v1127_v4 = vadd.f32 1.0, %v2280_v52  ;;  %v2048_v32 = vld [vmem:[#allocation2 + $0x14] ss:$8 sps:$4 sm:$0xff]   ;;  %v2050_v52 = vld [vmem:[#allocation2 + $0x10] ss:$8 sps:$4 sm:$0xff]  }
 0x1b3   : > { %v2284_v63 = vpop.eup %2283  ;;  %2303 = vrcp.f32 %v1126_v38  ;;  %1574 = vmatpush1.bf16.msra.mxu1 %v1365_v35  ;;  %v1128_v5 = vadd.f32 1.0, %v2282_v29  ;;  %v2051_v38 = vld [vmem:[#allocation2 + $0x24] ss:$8 sps:$4 sm:$0xff]   ;;  %v2053_v29 = vld [vmem:[#allocation2 + $0x20] ss:$8 sps:$4 sm:$0xff]  }
 0x1b4   : > { %v2286_v44 = vpop.eup %2285  ;;  %v1312_v13 = vmul.f32 %v2284_v63, %v2981_v42  ;;  %2305 = vpow2.f32 %v1907_v39  ;;  %v2060_v39 = vld [vmem:[#allocation2 + $0x54] ss:$8 sps:$4 sm:$0xff]   ;;  %v2062_v63 = vld [vmem:[#allocation2 + $0x50] ss:$8 sps:$4 sm:$0xff]  }
 0x1b5   : > { %v2288_v48 = vpop.eup %2287  ;;  %v1313_v16 = vmul.f32 %v2286_v44, %v2985_v54  ;;  %2307 = vpow2.f32 %v1908_v43  ;;  %v2063_v43 = vld [vmem:[#allocation2 + $0x64] ss:$8 sps:$4 sm:$0xff]   ;;  %v2065_v44 = vld [vmem:[#allocation2 + $0x60] ss:$8 sps:$4 sm:$0xff]  }
 0x1b6   : > { %v2290_v50 = vpop.eup %2289  ;;  %v1314_v51 = vmul.f32 %v2288_v48, %v2987_v27  ;;  %2309 = vrcp.f32 %v1127_v4  ;;  %v2066_v48 = vld [vmem:[#allocation2 + $0x74] ss:$8 sps:$4 sm:$0xff]  }
 0x1b7   : > { %v2292_v53 = vpop.eup %2291  ;;  %v1367_v19 = vpack.c.bf16 %v1313_v16, %v1311_v20  ;;  %2311 = vrcp.f32 %v1128_v5  ;;  %v1315_v59 = vmul.f32 %v2290_v50, %v2992_v56  ;;  %v2068_v20 = vld [vmem:[#allocation2 + $0x70] ss:$8 sps:$4 sm:$0xff]   ;;  %v1394_v16 = vpop.permute.xlu0 %1393 }
 0x1b8   : > { %v2294_v23 = vpop.eup %2293  ;;  %v1368_v58 = vpack.c.bf16 %v1314_v51, %v1312_v13  ;;  %v1316_v45 = vmul.f32 %v2292_v53, %v2995_v40  ;;  %v1399_v51 = vpop.permute.xlu1 %1398 }
 0x1b9   : > { %v2296_v60 = vpop.eup %2295  ;;  %v1129_v14 = vadd.f32 1.0, %v2294_v23 }
 0x1ba   : > { %v2298_v61 = vpop.eup %2297  ;;  %v1130_v22 = vadd.f32 1.0, %v2296_v60  ;;  %1575 = vmatprep.subr.bf16.mxu1 %v1368_v58 }
 0x1bb   : > { %v2300_v54 = vpop.eup %2299  ;;  %2313 = vrcp.f32 %v1129_v14  ;;  %1576 = vmatpush1.bf16.msra.mxu1 %v1367_v19  ;;  %v1131_v3 = vadd.f32 1.0, %v2298_v61  ;;  %v1404_v60 = vpop.permute.xlu0 %1403 }
 0x1bc   : > { %v2302_v42 = vpop.eup %2301  ;;  %2315 = vrcp.f32 %v1130_v22  ;;  %v1132_v7 = vadd.f32 1.0, %v2300_v54  ;;  %v1409_v54 = vpop.permute.xlu1 %1408 }
 0x1bd   : > { %v2304_v27 = vpop.eup %2303  ;;  %v1317_v18 = vmul.f32 %v2302_v42, %v3002_v10  ;;  %2317 = vrcp.f32 %v1131_v3 }
 0x1be   : > { %v1318_v57 = vmul.f32 %v2304_v27, %v3004_v26  ;;  %v2306_v9 = vpop.eup %2305  ;;  %2319 = vrcp.f32 %v1132_v7 }
 0x1bf   : > { %v1369_v8 = vpack.c.bf16 %v1317_v18, %v1315_v59  ;;  %v2308_v12 = vpop.eup %2307  ;;  %v1133_v62 = vadd.f32 1.0, %v2306_v9 }
 0x1c0   : > { %v1370_v0 = vpack.c.bf16 %v1318_v57, %v1316_v45  ;;  %v1134_v41 = vadd.f32 1.0, %v2308_v12  ;;  %v2310_v15 = vpop.eup %2309  ;;  %v1414_v45 = vpop.permute.xlu0 %1413 }
 0x1c1   : > { %2321 = vrcp.f32 %v1133_v62  ;;  %v2312_v56 = vpop.eup %2311  ;;  %v1319_v40 = vmul.f32 %v2310_v15, %v3008_v30  ;;  %v1419_v9 = vpop.permute.xlu1 %1418 }
 0x1c2   : > { %1577 = vmatprep.subr.bf16.mxu1 %v1370_v0  ;;  %2323 = vrcp.f32 %v1134_v41  ;;  %v1320_v17 = vmul.f32 %v2312_v56, %v3010_v21 }
 0x1c3   : > { %1578 = vmatpush1.bf16.msra.mxu1 %v1369_v8 }
 0x1c4   : > { %v1424_v56 = vpop.permute.xlu0 %1423 }
 0x1c5   : > { %v2314_v10 = vpop.eup %2313 }
 0x1c6   : > { %v2316_v49 = vpop.eup %2315  ;;  %v1321_v26 = vmul.f32 %v2314_v10, %v3018_v37 }
 0x1c7   : > { %v1322_v46 = vmul.f32 %v2316_v49, %v3020_v55  ;;  %v2318_v31 = vpop.eup %2317  ;;  %v2045_v55 = vld [vmem:[#allocation2] ss:$8 sps:$4 sm:$0xff]  }
 0x1c8   : > { %v1371_v24 = vpack.c.bf16 %v1321_v26, %v1319_v40  ;;  %v2320_v2 = vpop.eup %2319  ;;  %v1323_v35 = vmul.f32 %v2318_v31, %v3023_v1  ;;  %v2054_v1 = vld [vmem:[#allocation2 + $0x34] ss:$8 sps:$4 sm:$0xff]   ;;  %v1429_v26 = vpop.permute.xlu1 %1428 }
 0x1c9   : > { %v1372_v33 = vpack.c.bf16 %v1322_v46, %v1320_v17  ;;  %v1324_v30 = vmul.f32 %v2320_v2, %v3026_v34  ;;  %v2057_v34 = vld [vmem:[#allocation2 + $0x44] ss:$8 sps:$4 sm:$0xff]   ;;  %v1434_v2 = vpop.permute.xlu0 %1433 }
 0x1cb   : > { %1579 = vmatprep.subr.bf16.mxu1 %v1372_v33  ;;  %v2322_v25 = vpop.eup %2321 }
 0x1cc   : > { %1580 = vmatpush1.bf16.msra.mxu1 %v1371_v24  ;;  %v2324_v36 = vpop.eup %2323  ;;  %v1325_v11 = vmul.f32 %v2322_v25, %v3034_v28  ;;  %v2056_v28 = vld [vmem:[#allocation2 + $0x30] ss:$8 sps:$4 sm:$0xff]  }
 0x1cd   : > { %v1326_v37 = vmul.f32 %v2324_v36, %v3036_v6  ;;  %v2059_v6 = vld [vmem:[#allocation2 + $0x40] ss:$8 sps:$4 sm:$0xff]  }
 0x1ce   : > { %v1373_v47 = vpack.c.bf16 %v1325_v11, %v1323_v35  ;;  %v1439_v11 = vpop.permute.xlu1 %1438 }
 0x1cf   : > { %v1374_v21 = vpack.c.bf16 %v1326_v37, %v1324_v30 }
 0x1d1   : > { %1581 = vmatprep.subr.bf16.mxu1 %v1374_v21 }
 0x1d2   : > { %1582 = vmatpush1.bf16.msra.mxu1 %v1373_v47 }
 0x1d5   : > { %1584 = vmatmul.mubr.bf16.vlgmr.msra.gmra.mrb[0].mxu1 %v2045_v55 }
 0x1d6   : > { %1593 = vmatprep.mubr.bf16.mxu1 %v2048_v32  ;;  %v1444_v32 = vpop.permute.xlu0 %1443 }
 0x1dd   : > { %1594 = vmatmul.mubr.bf16.gmra.mrb[4].mxu1 %v2050_v52 }
 0x1de   : > { %1603 = vmatprep.mubr.bf16.mxu1 %v2051_v38 }
 0x1e5   : > { %1604 = vmatmul.mubr.bf16.gmra.mrb[8].mxu1 %v2053_v29 }
 0x1e6   : > { %1613 = vmatprep.mubr.bf16.mxu1 %v2054_v1  ;;  %v1449_v1 = vpop.permute.xlu1 %1448 }
 0x1ed   : > { %1614 = vmatmul.mubr.bf16.gmra.mrb[12].mxu1 %v2056_v28 }
 0x1ee   : > { %1623 = vmatprep.mubr.bf16.mxu1 %v2057_v34 }
 0x1f5   : > { %1624 = vmatmul.mubr.bf16.gmra.mrb[16].mxu1 %v2059_v6 }
 0x1f6   : > { %1633 = vmatprep.mubr.bf16.mxu1 %v2060_v39 }
 0x1fd   : > { %1634 = vmatmul.mubr.bf16.gmra.mrb[20].mxu1 %v2062_v63 }
 0x1fe   : > { %1643 = vmatprep.mubr.bf16.mxu1 %v2063_v43  ;;  %v1454_v43 = vpop.permute.xlu0 %1453 }
 0x205   : > { %1644 = vmatmul.mubr.bf16.gmra.mrb[24].mxu1 %v2065_v44 }
 0x206   : > { %1653 = vmatprep.mubr.bf16.mxu1 %v2066_v48 }
 0x20d   : > { %1654 = vmatmul.mubr.bf16.gmra.mrb[28].mxu1 %v2068_v20 }
 0x2a8   : > { %v1585_v4 = vpop.f32.mrb[0].mxu1 }
 0x2a9   : > { %v1586_v50 = vadd.f32 %v1585_v4, %v1394_v16  ;;  %v1587_v13 = vpop.f32.mrb[1].mxu1 }
 0x2aa   : > { %v1588_v5 = vadd.f32 %v1587_v13, %v1394_v16  ;;  %v1589_v53 = vpop.f32.mrb[2].mxu1  ;;  %v1459_v16 = vpop.permute.xlu1 %1458 }
 0x2ab   : > { %1664 = vst [vmem:[%s3059_s11] sm:$0xff] %v1586_v50  ;;  %v1590_v19 = vadd.f32 %v1589_v53, %v1399_v51  ;;  %v1591_v23 = vpop.f32.mrb[3].mxu1  ;;  %v1464_v53 = vpop.permute.xlu0 %1463 }
 0x2ac   : > { %1665 = vst [vmem:[%s3059_s11 + $0x8] sm:$0xff] %v1588_v5  ;;  %v1592_v58 = vadd.f32 %v1591_v23, %v1399_v51 }
 0x2ad   : > { %1666 = vst [vmem:[%s3059_s11 + $0x10] sm:$0xff] %v1590_v19 }
 0x2ae   : > { %1667 = vst [vmem:[%s3059_s11 + $0x18] sm:$0xff] %v1592_v58 }
 0x2b0   : > { %v1595_v14 = vpop.f32.mrb[4].mxu1 }
 0x2b1   : > { %v1596_v61 = vadd.f32 %v1595_v14, %v1404_v60  ;;  %v1597_v22 = vpop.f32.mrb[5].mxu1 }
 0x2b2   : > { %v1598_v42 = vadd.f32 %v1597_v22, %v1404_v60  ;;  %v1599_v27 = vpop.f32.mrb[6].mxu1  ;;  %v1469_v60 = vpop.permute.xlu1 %1468 }
 0x2b3   : > { %1668 = vst [vmem:[%s3059_s11 + $0x20] sm:$0xff] %v1596_v61  ;;  %v1600_v59 = vadd.f32 %v1599_v27, %v1409_v54  ;;  %v1601_v18 = vpop.f32.mrb[7].mxu1 }
 0x2b4   : > { %1669 = vst [vmem:[%s3059_s11 + $0x28] sm:$0xff] %v1598_v42  ;;  %v1602_v3 = vadd.f32 %v1601_v18, %v1409_v54 }
 0x2b5   : > { %1670 = vst [vmem:[%s3059_s11 + $0x30] sm:$0xff] %v1600_v59 }
 0x2b6   : > { %1671 = vst [vmem:[%s3059_s11 + $0x38] sm:$0xff] %v1602_v3 }
 0x2b8   : > { %v1605_v57 = vpop.f32.mrb[8].mxu1 }
 0x2b9   : > { %v1606_v7 = vadd.f32 %v1605_v57, %v1414_v45  ;;  %v1607_v8 = vpop.f32.mrb[9].mxu1 }
 0x2ba   : > { %v1608_v0 = vadd.f32 %v1607_v8, %v1414_v45  ;;  %v1609_v12 = vpop.f32.mrb[10].mxu1 }
 0x2bb   : > { %1672 = vst [vmem:[%s3059_s11 + $0x40] sm:$0xff] %v1606_v7  ;;  %v1610_v62 = vadd.f32 %v1609_v12, %v1419_v9  ;;  %v1611_v41 = vpop.f32.mrb[11].mxu1 }
 0x2bc   : > { %1673 = vst [vmem:[%s3059_s11 + $0x48] sm:$0xff] %v1608_v0  ;;  %v1612_v15 = vadd.f32 %v1611_v41, %v1419_v9 }
 0x2bd   : > { %1674 = vst [vmem:[%s3059_s11 + $0x50] sm:$0xff] %v1610_v62 }
 0x2be   : > { %1675 = vst [vmem:[%s3059_s11 + $0x58] sm:$0xff] %v1612_v15 }
 0x2c0   : > { %v1615_v10 = vpop.f32.mrb[12].mxu1 }
 0x2c1   : > { %v1616_v49 = vadd.f32 %v1615_v10, %v1424_v56  ;;  %v1617_v40 = vpop.f32.mrb[13].mxu1 }
 0x2c2   : > { %v1618_v17 = vadd.f32 %v1617_v40, %v1424_v56  ;;  %v1619_v46 = vpop.f32.mrb[14].mxu1 }
 0x2c3   : > { %1676 = vst [vmem:[%s3059_s11 + $0x60] sm:$0xff] %v1616_v49  ;;  %v1620_v24 = vadd.f32 %v1619_v46, %v1429_v26  ;;  %v1621_v33 = vpop.f32.mrb[15].mxu1 }
 0x2c4   : > { %1677 = vst [vmem:[%s3059_s11 + $0x68] sm:$0xff] %v1618_v17  ;;  %v1622_v31 = vadd.f32 %v1621_v33, %v1429_v26 }
 0x2c5   : > { %1678 = vst [vmem:[%s3059_s11 + $0x70] sm:$0xff] %v1620_v24 }
 0x2c6   : > { %1679 = vst [vmem:[%s3059_s11 + $0x78] sm:$0xff] %v1622_v31 }
 0x2c8   : > { %v1625_v25 = vpop.f32.mrb[16].mxu1 }
 0x2c9   : > { %v1626_v36 = vadd.f32 %v1625_v25, %v1434_v2  ;;  %v1627_v35 = vpop.f32.mrb[17].mxu1 }
 0x2ca   : > { %v1628_v30 = vadd.f32 %v1627_v35, %v1434_v2  ;;  %v1629_v37 = vpop.f32.mrb[18].mxu1 }
 0x2cb   : > { %1680 = vst [vmem:[%s3059_s11 + $0x80] sm:$0xff] %v1626_v36  ;;  %v1630_v47 = vadd.f32 %v1629_v37, %v1439_v11  ;;  %v1631_v21 = vpop.f32.mrb[19].mxu1 }
 0x2cc   : > { %1681 = vst [vmem:[%s3059_s11 + $0x88] sm:$0xff] %v1628_v30  ;;  %v1632_v55 = vadd.f32 %v1631_v21, %v1439_v11 }
 0x2cd   : > { %1682 = vst [vmem:[%s3059_s11 + $0x90] sm:$0xff] %v1630_v47 }
 0x2ce   : > { %1683 = vst [vmem:[%s3059_s11 + $0x98] sm:$0xff] %v1632_v55 }
 0x2d0   : > { %v1635_v52 = vpop.f32.mrb[20].mxu1 }
 0x2d1   : > { %v1636_v38 = vadd.f32 %v1635_v52, %v1444_v32  ;;  %v1637_v29 = vpop.f32.mrb[21].mxu1 }
 0x2d2   : > { %v1638_v28 = vadd.f32 %v1637_v29, %v1444_v32  ;;  %v1639_v34 = vpop.f32.mrb[22].mxu1 }
 0x2d3   : > { %1684 = vst [vmem:[%s3059_s11 + $0xa0] sm:$0xff] %v1636_v38  ;;  %v1640_v6 = vadd.f32 %v1639_v34, %v1449_v1  ;;  %v1641_v39 = vpop.f32.mrb[23].mxu1 }
 0x2d4   : > { %1685 = vst [vmem:[%s3059_s11 + $0xa8] sm:$0xff] %v1638_v28  ;;  %v1642_v63 = vadd.f32 %v1641_v39, %v1449_v1 }
 0x2d5   : > { %1686 = vst [vmem:[%s3059_s11 + $0xb0] sm:$0xff] %v1640_v6 }
 0x2d6   : > { %1687 = vst [vmem:[%s3059_s11 + $0xb8] sm:$0xff] %v1642_v63 }
 0x2d8   : > { %v1645_v44 = vpop.f32.mrb[24].mxu1 }
 0x2d9   : > { %v1646_v48 = vadd.f32 %v1645_v44, %v1454_v43  ;;  %v1647_v20 = vpop.f32.mrb[25].mxu1 }
 0x2da   : > { %v1648_v4 = vadd.f32 %v1647_v20, %v1454_v43  ;;  %v1649_v50 = vpop.f32.mrb[26].mxu1 }
 0x2db   : > { %1688 = vst [vmem:[%s3059_s11 + $0xc0] sm:$0xff] %v1646_v48  ;;  %v1650_v13 = vadd.f32 %v1649_v50, %v1459_v16  ;;  %v1651_v51 = vpop.f32.mrb[27].mxu1 }
 0x2dc   : > { %1689 = vst [vmem:[%s3059_s11 + $0xc8] sm:$0xff] %v1648_v4  ;;  %v1652_v5 = vadd.f32 %v1651_v51, %v1459_v16 }
 0x2dd   : > { %1690 = vst [vmem:[%s3059_s11 + $0xd0] sm:$0xff] %v1650_v13 }
 0x2de   : > { %1691 = vst [vmem:[%s3059_s11 + $0xd8] sm:$0xff] %v1652_v5 }
 0x2e0   : > { %v1655_v19 = vpop.f32.mrb[28].mxu1 }
 0x2e1   : > { %v1656_v23 = vadd.f32 %v1655_v19, %v1464_v53  ;;  %v1657_v58 = vpop.f32.mrb[29].mxu1 }
 0x2e2   : > { %v1658_v14 = vadd.f32 %v1657_v58, %v1464_v53  ;;  %v1659_v61 = vpop.f32.mrb[30].mxu1 }
 0x2e3   : > { %1692 = vst [vmem:[%s3059_s11 + $0xe0] sm:$0xff] %v1656_v23  ;;  %v1660_v22 = vadd.f32 %v1659_v61, %v1469_v60  ;;  %v1661_v54 = vpop.f32.mrb[31].mxu1 }
 0x2e4   : > { %1693 = vst [vmem:[%s3059_s11 + $0xe8] sm:$0xff] %v1658_v14  ;;  %v1662_v42 = vadd.f32 %v1661_v54, %v1469_v60 }
 0x2e5   : > { %1694 = vst [vmem:[%s3059_s11 + $0xf0] sm:$0xff] %v1660_v22 }
 0x2e6   : > { %1695 = vst [vmem:[%s3059_s11 + $0xf8] sm:$0xff] %v1662_v42 }
 0x2e7   : > { %2366 = shalt.err (!%p2363_p6)
}
 0x2e8   : > { %s2367_s14 = scalar_lea.hbm %s3095_s15, 4096  ;;  %s2371_s9 = scalar_lea.hbm %s3155_s5, 8192 }
 0x2e9   : > { %p2368_p7 = scmp.ne.s32.totalorder %s3095_s15, %s2367_s14  ;;  %p2372_p0 = scmp.lt.u32.totalorder %s3095_s15, %s3155_s5 }
 0x2ea   : > { %p2373_p2 = scmp.lt.u32.totalorder %s2371_s9, %s2367_s14  ;;  %p2375_p8 = scmp.lt.u32.totalorder %s2367_s14, %s3095_s15 }
 0x2eb   : > { %p2369_p9 = pnand %p2368_p7, %p3167_p10 }
 0x2ec   : > { %p2374_p4 = por %p2373_p2, %p2372_p0 }
 0x2ed   : > { %p2370_p12 = pneg %p2369_p9 }
 0x2ee   : > { %p2376_p11 = por %p2375_p8, %p2374_p4 }
 0x2f0   : > { %p2377_p13 = pnand %p2376_p11, %p2370_p12 }
 0x2f2   : > { %2380 = shalt.err (!%p2377_p13)
}
 0x2f3   : > { %s2442_s10 = smov 256   ;;  %s2443_s13 = smov 16  }
 0x2f4   : > { %1936 = dma.vmem_to_hbm [thread:$0]  (%p3167_p10), %s3097_s7, 4096, %s3095_s15, %s3104_s21, %s2442_s10, %s2442_s10, %s2443_s13  }
 0x2f5 PF: > { %p1948_p1 = scmp.ge.s32.totalorder %s2435_s23, 2  ;;  %s1727_s8 = sand.u32 1, %s2415_s18  }
 0x2f6   : > { %p3168_p3 = scmp.ne.s32.totalorder %s3161_s30, 0  ;;  %s1728_s16 = scalar_lea.sflag [#allocation4], %s1727_s8 }
 0x2f8   : > { %p1943_p5 = pnand %p1948_p1, %p3168_p3 }
 0x2fa   : > { %2410 = dma.done.wait (!%p1943_p5), %s1728_s16, 4096  }
 0x2fb   : > { %2412 = vsyncadd (!%p1943_p5), %s1728_s16, 4294963200  ;;  %s19_s23 = sadd.s32 1, %s2435_s23   ;;  %s3169_s18 = smov %s2419_s19 }
 0x2fc   : > { %p16_p6 = scmp.ge.s32.totalorder %s19_s23, 4   ;;  %s3170_s19 = smov %s2423_s20 }
 0x2fd   : > { %s3171_s20 = smov %s2527_s6  ;;  %s3172_s21 = smov %s2431_s22 }
 0x2fe   : > { %s3173_s22 = smov %s3175_s26  ;;  %18 = sbr.rel (!%p16_p6) target bundleno = 5 (0x5), region = 80 }
 0x305   :  { %1733 = vsyncpa [#allocation3], 1 }
 0x306   :  { %1735 = vsyncpa [#allocation3 + $0x1], 1 }
 0x307   :  { %1736 = vsyncpa [#allocation4], 1 }
 0x308   :  { %1738 = vsyncpa [#allocation4 + $0x1], 1 }

</bundles_post_ra>
